<compile_context>
chip_gen: v7x
topology: tpu7x:2x2x1
jax: 0.10.0
libtpu: 0.0.40
codegen_flags: <defaults>
</compile_context>

<pallas_src>
import functools

import jax
import jax.numpy as jnp
from jax import lax
from jax.experimental import pallas as pl
from jax.experimental.pallas import tpu as pltpu


def msrb_kernel(x_ref, w1_ref, b1_ref, wcy_ref, wcx_ref, bc_ref, o_ref,
                xflat_s, col_s, *, H, W):
    Cin = x_ref.shape[1]
    HW = H * W
    x2d = x_ref[0].astype(jnp.float32)                      # (Cin, H*W), lane-dense

    # Zero-padded flat input: xflat[c, 2*W + 2 + h*W + w] = x[c, h, w].
    # A conv tap (di, dj) then reads the contiguous lane slice starting at
    # di*W + dj (masked where w + dj - 2 falls outside [0, W)).
    xflat_s[...] = jnp.zeros_like(xflat_s)
    xflat_s[:, 2 * W + 2:2 * W + 2 + HW] = x2d

    # w-coordinate of every flattened output position (for the width mask).
    wcol = lax.broadcasted_iota(jnp.int32, (1, HW), 1) % W

    # im2col: 25 lane-shifted (+ masked) copies of the flat input.
    for dj in range(5):
        shift = dj - 2
        if shift == 0:
            m = None                                        # center column: no mask
        else:
            m = ((wcol + shift >= 0) & (wcol + shift < W)).astype(jnp.float32)
        for di in range(5):
            t = di * 5 + dj
            patch = xflat_s[:, di * W + dj:di * W + dj + HW]    # (Cin, H*W)
            if m is not None:
                patch = patch * m
            col_s[t * Cin:(t + 1) * Cin, :] = patch

    # Both conv branches (3x3 zero-padded to 5x5, stacked along Cout) in ONE
    # MXU matmul, bias + LeakyReLU(0.2) fused.
    y = jnp.dot(w1_ref[...], col_s[...], preferred_element_type=jnp.float32)
    y = y + b1_ref[...]
    y = jnp.where(y > 0, y, 0.2 * y)                        # (2*Cout, H*W)

    # confusion 1x1 conv over concat([y3, y5, x]) without materializing the
    # concat, then the final LeakyReLU(0.2).
    out = (jnp.dot(wcy_ref[...], y, preferred_element_type=jnp.float32)
           + jnp.dot(wcx_ref[...], x2d, preferred_element_type=jnp.float32)
           + bc_ref[...])
    out = jnp.where(out > 0, out, 0.2 * out)                # (Cout, H*W)
    o_ref[...] = out[None, :, :].astype(o_ref.dtype)


def msrb_block(x_nchw, params):
    """x_nchw: (N, Cin, H, W) float32, same layout as the PyTorch module."""
    N, Cin, H, W = x_nchw.shape
    w3, b3, w5, b5, wc, bc = params
    Cout = w3.shape[-1]
    HW = H * W

    # ---- one-time parameter prep (XLA glue, outside the kernel) ----
    w3p = jnp.pad(w3, ((1, 1), (1, 1), (0, 0), (0, 0)))     # 3x3 -> 5x5 center-aligned
    w_st = jnp.concatenate([w3p, w5], axis=-1)              # (5, 5, Cin, 2*Cout)
    w1 = jnp.transpose(w_st, (3, 0, 1, 2)).reshape(2 * Cout, 25 * Cin)
    b1 = jnp.concatenate([b3, b5]).reshape(2 * Cout, 1)
    wcy = wc[:2 * Cout, :].T                                # (Cout, 2*Cout) -> acts on [y3, y5]
    wcx = wc[2 * Cout:, :].T                                # (Cout, Cin)    -> acts on x
    bc2 = bc.reshape(Cout, 1)

    x_flat = x_nchw.reshape(N, Cin, HW)                     # contiguous, free reshape

    def const_spec(arr):
        return pl.BlockSpec(arr.shape, lambda b: (0, 0))    # grid-invariant 2-D weight

    kernel = functools.partial(msrb_kernel, H=H, W=W)
    out = pl.pallas_call(
        kernel,
        out_shape=jax.ShapeDtypeStruct((N, Cout, HW), x_nchw.dtype),
        grid_spec=pltpu.PrefetchScalarGridSpec(
            num_scalar_prefetch=0,
            grid=(N,),
            in_specs=[
                pl.BlockSpec((1, Cin, HW), lambda b: (b, 0, 0)),
                const_spec(w1), const_spec(b1),
                const_spec(wcy), const_spec(wcx), const_spec(bc2),
            ],
            out_specs=pl.BlockSpec((1, Cout, HW), lambda b: (b, 0, 0)),
            scratch_shapes=[
                pltpu.VMEM((Cin, HW + 4 * W + 4), jnp.float32),   # flat zero-padded input
                pltpu.VMEM((25 * Cin, HW), jnp.float32),          # im2col matrix
            ],
        ),
        compiler_params=pltpu.CompilerParams(
            dimension_semantics=("parallel",),   # batches independent -> both v7x TCs
            vmem_limit_bytes=32 * 1024 * 1024,
        ),
    )(x_flat, w1, b1, wcy, wcx, bc2)
    return out.reshape(N, Cout, H, W)


def init_params(key, in_channels, out_channels):
    # PyTorch declares confusion as Conv2d(in_channels * 3, out_channels), but
    # the concat it consumes is [y3 (Cout), y5 (Cout), x (Cin)] -> the module is
    # only well-formed when out_channels == in_channels.
    assert in_channels == out_channels, "MSRB_Block requires in_channels == out_channels"
    ks = jax.random.split(key, 6)

    def nrm(k, shape, scale):
        return jax.random.normal(k, shape, jnp.float32) * scale

    w3 = nrm(ks[0], (3, 3, in_channels, out_channels), 0.10)
    b3 = nrm(ks[1], (out_channels,), 0.10)
    w5 = nrm(ks[2], (5, 5, in_channels, out_channels), 0.05)
    b5 = nrm(ks[3], (out_channels,), 0.10)
    wc = nrm(ks[4], (2 * out_channels + in_channels, out_channels), 0.20)
    bc = nrm(ks[5], (out_channels,), 0.10)
    return (w3, b3, w5, b5, wc, bc)


def ref_forward(x_nchw, params):
    """Plain-JAX reference mirroring the PyTorch forward (correctness check)."""
    w3, b3, w5, b5, wc, bc = params
    x = x_nchw.astype(jnp.float32)

    def conv(x_, w_hwio, b_, pad):
        y = lax.conv_general_dilated(
            x_, w_hwio, window_strides=(1, 1),
            padding=[(pad, pad), (pad, pad)],
            dimension_numbers=('NCHW', 'HWIO', 'NCHW'))
        return y + b_.reshape(1, -1, 1, 1)

    lrelu = lambda t: jnp.where(t > 0, t, 0.2 * t)
    y3 = lrelu(conv(x, w3, b3, 1))
    y5 = lrelu(conv(x, w5, b5, 2))
    cat = jnp.concatenate([y3, y5, x], axis=1)                   # (N, 2*Cout+Cin, H, W)
    out = jnp.einsum('nchw,cd->ndhw', cat, wc) + bc.reshape(1, -1, 1, 1)
    return lrelu(out)


if __name__ == "__main__":
    key = jax.random.PRNGKey(0)
    kx, kp = jax.random.split(key)

    N, C, H, W = 2, 4, 16, 16                                    # in_channels = out_channels = 4
    x = jax.random.normal(kx, (N, C, H, W), jnp.float32)
    params = init_params(kp, in_channels=C, out_channels=C)

    out = jax.block_until_ready(msrb_block(x, params))
    ref = jax.block_until_ready(ref_forward(x, params))

    assert out.shape == ref.shape == (N, C, H, W)
    assert jnp.allclose(out, ref, atol=1e-3, rtol=1e-3), "mismatch vs plain-JAX reference"

    print("KERNEL_OK")
</pallas_src>

<mosaic_0001>
module attributes {stable_mosaic.version = 11 : i64} {
  func.func @msrb_kernel(%arg0: i32, %arg1: memref<1x4x256xf32, #tpu.memory_space<vmem>>, %arg2: memref<8x100xf32, #tpu.memory_space<vmem>>, %arg3: memref<8x1xf32, #tpu.memory_space<vmem>>, %arg4: memref<4x8xf32, #tpu.memory_space<vmem>>, %arg5: memref<4x4xf32, #tpu.memory_space<vmem>>, %arg6: memref<4x1xf32, #tpu.memory_space<vmem>>, %arg7: memref<1x4x256xf32, #tpu.memory_space<vmem>>, %arg8: memref<4x324xf32, #tpu.memory_space<vmem>>, %arg9: memref<100x256xf32, #tpu.memory_space<vmem>>) attributes {dimension_semantics = [#tpu.dimension_semantics<parallel>], iteration_bounds = array<i64: 2>, scalar_prefetch = 0 : i64, scratch_operands = 2 : i64, tpu.core_type = #tpu.core_type<tc>, window_params = [{transform_indices = @transform_0, window_bounds = array<i64: 1, 4, 256>}, {pipeline_mode = #tpu.pipeline_mode<synchronous>, transform_indices = @transform_1, window_bounds = array<i64: 8, 100>}, {pipeline_mode = #tpu.pipeline_mode<synchronous>, transform_indices = @transform_2, window_bounds = array<i64: 8, 1>}, {pipeline_mode = #tpu.pipeline_mode<synchronous>, transform_indices = @transform_3, window_bounds = array<i64: 4, 8>}, {pipeline_mode = #tpu.pipeline_mode<synchronous>, transform_indices = @transform_4, window_bounds = array<i64: 4, 4>}, {pipeline_mode = #tpu.pipeline_mode<synchronous>, transform_indices = @transform_5, window_bounds = array<i64: 4, 1>}, {transform_indices = @transform_6, window_bounds = array<i64: 1, 4, 256>}]} {
    %c0 = arith.constant 0 : index
    %c0_0 = arith.constant 0 : index
    %c0_1 = arith.constant 0 : index
    %0 = vector.load %arg1[%c0, %c0_0, %c0_1] : memref<1x4x256xf32, #tpu.memory_space<vmem>>, vector<1x4x256xf32>
    %1 = vector.shape_cast %0 : vector<1x4x256xf32> to vector<4x256xf32>
    %cst = arith.constant 0.000000e+00 : f32
    %2 = vector.broadcast %cst : f32 to vector<4x324xf32>
    %c0_2 = arith.constant 0 : index
    %c0_3 = arith.constant 0 : index
    %3 = vector.load %arg8[%c0_2, %c0_3] : memref<4x324xf32, #tpu.memory_space<vmem>>, vector<4x324xf32>
    tpu.vector_store %arg8[%c0_2, %c0_3], %2 {strides = array<i32>} : memref<4x324xf32, #tpu.memory_space<vmem>>, vector<4x324xf32>,
    %c0_4 = arith.constant 0 : index
    %c34 = arith.constant 34 : index
    %4 = vector.load %arg8[%c0_4, %c34] : memref<4x324xf32, #tpu.memory_space<vmem>>, vector<4x256xf32>
    tpu.vector_store %arg8[%c0_4, %c34], %1 {strides = array<i32>} : memref<4x324xf32, #tpu.memory_space<vmem>>, vector<4x256xf32>,
    %5 = tpu.iota {dimensions = array<i32: 1>} : vector<1x256xi32>
    %c16_i32 = arith.constant 16 : i32
    %c0_i32 = arith.constant 0 : i32
    %6 = arith.cmpi eq, %c16_i32, %c0_i32 : i32
    %c1_i32 = arith.constant 1 : i32
    %7 = arith.select %6, %c1_i32, %c16_i32 : i32
    %8 = vector.broadcast %7 : i32 to vector<1x256xi32>
    %9 = arith.remsi %5, %8 : vector<1x256xi32>
    %c0_i32_5 = arith.constant 0 : i32
    %10 = vector.broadcast %c0_i32_5 : i32 to vector<1x256xi32>
    %11 = arith.cmpi ne, %9, %10 : vector<1x256xi32>
    %c0_i32_6 = arith.constant 0 : i32
    %12 = vector.broadcast %c0_i32_6 : i32 to vector<1x256xi32>
    %13 = arith.cmpi slt, %9, %12 : vector<1x256xi32>
    %c0_i32_7 = arith.constant 0 : i32
    %14 = arith.cmpi slt, %7, %c0_i32_7 : i32
    %15 = vector.broadcast %14 : i1 to vector<1x256xi1>
    %16 = vector.broadcast %15 : vector<1x256xi1> to vector<1x256xi1>
    %17 = arith.xori %13, %16 : vector<1x256xi1>
    %18 = arith.andi %17, %11 : vector<1x256xi1>
    %19 = vector.broadcast %7 : i32 to vector<1x256xi32>
    %20 = arith.addi %9, %19 : vector<1x256xi32>
    %21 = arith.select %18, %20, %9 : vector<1x256xi1>, vector<1x256xi32>
    %c-2_i32 = arith.constant -2 : i32
    %22 = vector.broadcast %c-2_i32 : i32 to vector<1x256xi32>
    %23 = arith.addi %21, %22 : vector<1x256xi32>
    %c0_i32_8 = arith.constant 0 : i32
    %24 = vector.broadcast %c0_i32_8 : i32 to vector<1x256xi32>
    %25 = arith.cmpi sge, %23, %24 : vector<1x256xi32>
    %c-2_i32_9 = arith.constant -2 : i32
    %26 = vector.broadcast %c-2_i32_9 : i32 to vector<1x256xi32>
    %27 = arith.addi %21, %26 : vector<1x256xi32>
    %c16_i32_10 = arith.constant 16 : i32
    %28 = vector.broadcast %c16_i32_10 : i32 to vector<1x256xi32>
    %29 = arith.cmpi slt, %27, %28 : vector<1x256xi32>
    %30 = arith.andi %25, %29 : vector<1x256xi1>
    %31 = arith.extui %30 : vector<1x256xi1> to vector<1x256xi32>
    %32 = arith.sitofp %31 : vector<1x256xi32> to vector<1x256xf32>
    %c0_11 = arith.constant 0 : index
    %c0_12 = arith.constant 0 : index
    %33 = vector.load %arg8[%c0_11, %c0_12] : memref<4x324xf32, #tpu.memory_space<vmem>>, vector<4x256xf32>
    %34 = vector.broadcast %32 : vector<1x256xf32> to vector<4x256xf32>
    %35 = arith.mulf %33, %34 : vector<4x256xf32>
    %c0_13 = arith.constant 0 : index
    %c0_14 = arith.constant 0 : index
    %36 = vector.load %arg9[%c0_13, %c0_14] : memref<100x256xf32, #tpu.memory_space<vmem>>, vector<4x256xf32>
    tpu.vector_store %arg9[%c0_13, %c0_14], %35 {strides = array<i32>} : memref<100x256xf32, #tpu.memory_space<vmem>>, vector<4x256xf32>,
    %c0_15 = arith.constant 0 : index
    %c16 = arith.constant 16 : index
    %37 = vector.load %arg8[%c0_15, %c16] : memref<4x324xf32, #tpu.memory_space<vmem>>, vector<4x256xf32>
    %38 = vector.broadcast %32 : vector<1x256xf32> to vector<4x256xf32>
    %39 = arith.mulf %37, %38 : vector<4x256xf32>
    %c20 = arith.constant 20 : index
    %c0_16 = arith.constant 0 : index
    %40 = vector.load %arg9[%c20, %c0_16] : memref<100x256xf32, #tpu.memory_space<vmem>>, vector<4x256xf32>
    tpu.vector_store %arg9[%c20, %c0_16], %39 {strides = array<i32>} : memref<100x256xf32, #tpu.memory_space<vmem>>, vector<4x256xf32>,
    %c0_17 = arith.constant 0 : index
    %c32 = arith.constant 32 : index
    %41 = vector.load %arg8[%c0_17, %c32] : memref<4x324xf32, #tpu.memory_space<vmem>>, vector<4x256xf32>
    %42 = vector.broadcast %32 : vector<1x256xf32> to vector<4x256xf32>
    %43 = arith.mulf %41, %42 : vector<4x256xf32>
    %c40 = arith.constant 40 : index
    %c0_18 = arith.constant 0 : index
    %44 = vector.load %arg9[%c40, %c0_18] : memref<100x256xf32, #tpu.memory_space<vmem>>, vector<4x256xf32>
    tpu.vector_store %arg9[%c40, %c0_18], %43 {strides = array<i32>} : memref<100x256xf32, #tpu.memory_space<vmem>>, vector<4x256xf32>,
    %c0_19 = arith.constant 0 : index
    %c48 = arith.constant 48 : index
    %45 = vector.load %arg8[%c0_19, %c48] : memref<4x324xf32, #tpu.memory_space<vmem>>, vector<4x256xf32>
    %46 = vector.broadcast %32 : vector<1x256xf32> to vector<4x256xf32>
    %47 = arith.mulf %45, %46 : vector<4x256xf32>
    %c60 = arith.constant 60 : index
    %c0_20 = arith.constant 0 : index
    %48 = vector.load %arg9[%c60, %c0_20] : memref<100x256xf32, #tpu.memory_space<vmem>>, vector<4x256xf32>
    tpu.vector_store %arg9[%c60, %c0_20], %47 {strides = array<i32>} : memref<100x256xf32, #tpu.memory_space<vmem>>, vector<4x256xf32>,
    %c0_21 = arith.constant 0 : index
    %c64 = arith.constant 64 : index
    %49 = vector.load %arg8[%c0_21, %c64] : memref<4x324xf32, #tpu.memory_space<vmem>>, vector<4x256xf32>
    %50 = vector.broadcast %32 : vector<1x256xf32> to vector<4x256xf32>
    %51 = arith.mulf %49, %50 : vector<4x256xf32>
    %c80 = arith.constant 80 : index
    %c0_22 = arith.constant 0 : index
    %52 = vector.load %arg9[%c80, %c0_22] : memref<100x256xf32, #tpu.memory_space<vmem>>, vector<4x256xf32>
    tpu.vector_store %arg9[%c80, %c0_22], %51 {strides = array<i32>} : memref<100x256xf32, #tpu.memory_space<vmem>>, vector<4x256xf32>,
    %c-1_i32 = arith.constant -1 : i32
    %53 = vector.broadcast %c-1_i32 : i32 to vector<1x256xi32>
    %54 = arith.addi %21, %53 : vector<1x256xi32>
    %c0_i32_23 = arith.constant 0 : i32
    %55 = vector.broadcast %c0_i32_23 : i32 to vector<1x256xi32>
    %56 = arith.cmpi sge, %54, %55 : vector<1x256xi32>
    %c-1_i32_24 = arith.constant -1 : i32
    %57 = vector.broadcast %c-1_i32_24 : i32 to vector<1x256xi32>
    %58 = arith.addi %21, %57 : vector<1x256xi32>
    %c16_i32_25 = arith.constant 16 : i32
    %59 = vector.broadcast %c16_i32_25 : i32 to vector<1x256xi32>
    %60 = arith.cmpi slt, %58, %59 : vector<1x256xi32>
    %61 = arith.andi %56, %60 : vector<1x256xi1>
    %62 = arith.extui %61 : vector<1x256xi1> to vector<1x256xi32>
    %63 = arith.sitofp %62 : vector<1x256xi32> to vector<1x256xf32>
    %c0_26 = arith.constant 0 : index
    %c1 = arith.constant 1 : index
    %64 = vector.load %arg8[%c0_26, %c1] : memref<4x324xf32, #tpu.memory_space<vmem>>, vector<4x256xf32>
    %65 = vector.broadcast %63 : vector<1x256xf32> to vector<4x256xf32>
    %66 = arith.mulf %64, %65 : vector<4x256xf32>
    %c4 = arith.constant 4 : index
    %c0_27 = arith.constant 0 : index
    %67 = vector.load %arg9[%c4, %c0_27] : memref<100x256xf32, #tpu.memory_space<vmem>>, vector<4x256xf32>
    tpu.vector_store %arg9[%c4, %c0_27], %66 {strides = array<i32>} : memref<100x256xf32, #tpu.memory_space<vmem>>, vector<4x256xf32>,
    %c0_28 = arith.constant 0 : index
    %c17 = arith.constant 17 : index
    %68 = vector.load %arg8[%c0_28, %c17] : memref<4x324xf32, #tpu.memory_space<vmem>>, vector<4x256xf32>
    %69 = vector.broadcast %63 : vector<1x256xf32> to vector<4x256xf32>
    %70 = arith.mulf %68, %69 : vector<4x256xf32>
    %c24 = arith.constant 24 : index
    %c0_29 = arith.constant 0 : index
    %71 = vector.load %arg9[%c24, %c0_29] : memref<100x256xf32, #tpu.memory_space<vmem>>, vector<4x256xf32>
    tpu.vector_store %arg9[%c24, %c0_29], %70 {strides = array<i32>} : memref<100x256xf32, #tpu.memory_space<vmem>>, vector<4x256xf32>,
    %c0_30 = arith.constant 0 : index
    %c33 = arith.constant 33 : index
    %72 = vector.load %arg8[%c0_30, %c33] : memref<4x324xf32, #tpu.memory_space<vmem>>, vector<4x256xf32>
    %73 = vector.broadcast %63 : vector<1x256xf32> to vector<4x256xf32>
    %74 = arith.mulf %72, %73 : vector<4x256xf32>
    %c44 = arith.constant 44 : index
    %c0_31 = arith.constant 0 : index
    %75 = vector.load %arg9[%c44, %c0_31] : memref<100x256xf32, #tpu.memory_space<vmem>>, vector<4x256xf32>
    tpu.vector_store %arg9[%c44, %c0_31], %74 {strides = array<i32>} : memref<100x256xf32, #tpu.memory_space<vmem>>, vector<4x256xf32>,
    %c0_32 = arith.constant 0 : index
    %c49 = arith.constant 49 : index
    %76 = vector.load %arg8[%c0_32, %c49] : memref<4x324xf32, #tpu.memory_space<vmem>>, vector<4x256xf32>
    %77 = vector.broadcast %63 : vector<1x256xf32> to vector<4x256xf32>
    %78 = arith.mulf %76, %77 : vector<4x256xf32>
    %c64_33 = arith.constant 64 : index
    %c0_34 = arith.constant 0 : index
    %79 = vector.load %arg9[%c64_33, %c0_34] : memref<100x256xf32, #tpu.memory_space<vmem>>, vector<4x256xf32>
    tpu.vector_store %arg9[%c64_33, %c0_34], %78 {strides = array<i32>} : memref<100x256xf32, #tpu.memory_space<vmem>>, vector<4x256xf32>,
    %c0_35 = arith.constant 0 : index
    %c65 = arith.constant 65 : index
    %80 = vector.load %arg8[%c0_35, %c65] : memref<4x324xf32, #tpu.memory_space<vmem>>, vector<4x256xf32>
    %81 = vector.broadcast %63 : vector<1x256xf32> to vector<4x256xf32>
    %82 = arith.mulf %80, %81 : vector<4x256xf32>
    %c84 = arith.constant 84 : index
    %c0_36 = arith.constant 0 : index
    %83 = vector.load %arg9[%c84, %c0_36] : memref<100x256xf32, #tpu.memory_space<vmem>>, vector<4x256xf32>
    tpu.vector_store %arg9[%c84, %c0_36], %82 {strides = array<i32>} : memref<100x256xf32, #tpu.memory_space<vmem>>, vector<4x256xf32>,
    %c0_37 = arith.constant 0 : index
    %c2 = arith.constant 2 : index
    %84 = vector.load %arg8[%c0_37, %c2] : memref<4x324xf32, #tpu.memory_space<vmem>>, vector<4x256xf32>
    %c8 = arith.constant 8 : index
    %c0_38 = arith.constant 0 : index
    %85 = vector.load %arg9[%c8, %c0_38] : memref<100x256xf32, #tpu.memory_space<vmem>>, vector<4x256xf32>
    tpu.vector_store %arg9[%c8, %c0_38], %84 {strides = array<i32>} : memref<100x256xf32, #tpu.memory_space<vmem>>, vector<4x256xf32>,
    %c0_39 = arith.constant 0 : index
    %c18 = arith.constant 18 : index
    %86 = vector.load %arg8[%c0_39, %c18] : memref<4x324xf32, #tpu.memory_space<vmem>>, vector<4x256xf32>
    %c28 = arith.constant 28 : index
    %c0_40 = arith.constant 0 : index
    %87 = vector.load %arg9[%c28, %c0_40] : memref<100x256xf32, #tpu.memory_space<vmem>>, vector<4x256xf32>
    tpu.vector_store %arg9[%c28, %c0_40], %86 {strides = array<i32>} : memref<100x256xf32, #tpu.memory_space<vmem>>, vector<4x256xf32>,
    %c0_41 = arith.constant 0 : index
    %c34_42 = arith.constant 34 : index
    %88 = vector.load %arg8[%c0_41, %c34_42] : memref<4x324xf32, #tpu.memory_space<vmem>>, vector<4x256xf32>
    %c48_43 = arith.constant 48 : index
    %c0_44 = arith.constant 0 : index
    %89 = vector.load %arg9[%c48_43, %c0_44] : memref<100x256xf32, #tpu.memory_space<vmem>>, vector<4x256xf32>
    tpu.vector_store %arg9[%c48_43, %c0_44], %88 {strides = array<i32>} : memref<100x256xf32, #tpu.memory_space<vmem>>, vector<4x256xf32>,
    %c0_45 = arith.constant 0 : index
    %c50 = arith.constant 50 : index
    %90 = vector.load %arg8[%c0_45, %c50] : memref<4x324xf32, #tpu.memory_space<vmem>>, vector<4x256xf32>
    %c68 = arith.constant 68 : index
    %c0_46 = arith.constant 0 : index
    %91 = vector.load %arg9[%c68, %c0_46] : memref<100x256xf32, #tpu.memory_space<vmem>>, vector<4x256xf32>
    tpu.vector_store %arg9[%c68, %c0_46], %90 {strides = array<i32>} : memref<100x256xf32, #tpu.memory_space<vmem>>, vector<4x256xf32>,
    %c0_47 = arith.constant 0 : index
    %c66 = arith.constant 66 : index
    %92 = vector.load %arg8[%c0_47, %c66] : memref<4x324xf32, #tpu.memory_space<vmem>>, vector<4x256xf32>
    %c88 = arith.constant 88 : index
    %c0_48 = arith.constant 0 : index
    %93 = vector.load %arg9[%c88, %c0_48] : memref<100x256xf32, #tpu.memory_space<vmem>>, vector<4x256xf32>
    tpu.vector_store %arg9[%c88, %c0_48], %92 {strides = array<i32>} : memref<100x256xf32, #tpu.memory_space<vmem>>, vector<4x256xf32>,
    %c1_i32_49 = arith.constant 1 : i32
    %94 = vector.broadcast %c1_i32_49 : i32 to vector<1x256xi32>
    %95 = arith.addi %21, %94 : vector<1x256xi32>
    %c0_i32_50 = arith.constant 0 : i32
    %96 = vector.broadcast %c0_i32_50 : i32 to vector<1x256xi32>
    %97 = arith.cmpi sge, %95, %96 : vector<1x256xi32>
    %c1_i32_51 = arith.constant 1 : i32
    %98 = vector.broadcast %c1_i32_51 : i32 to vector<1x256xi32>
    %99 = arith.addi %21, %98 : vector<1x256xi32>
    %c16_i32_52 = arith.constant 16 : i32
    %100 = vector.broadcast %c16_i32_52 : i32 to vector<1x256xi32>
    %101 = arith.cmpi slt, %99, %100 : vector<1x256xi32>
    %102 = arith.andi %97, %101 : vector<1x256xi1>
    %103 = arith.extui %102 : vector<1x256xi1> to vector<1x256xi32>
    %104 = arith.sitofp %103 : vector<1x256xi32> to vector<1x256xf32>
    %c0_53 = arith.constant 0 : index
    %c3 = arith.constant 3 : index
    %105 = vector.load %arg8[%c0_53, %c3] : memref<4x324xf32, #tpu.memory_space<vmem>>, vector<4x256xf32>
    %106 = vector.broadcast %104 : vector<1x256xf32> to vector<4x256xf32>
    %107 = arith.mulf %105, %106 : vector<4x256xf32>
    %c12 = arith.constant 12 : index
    %c0_54 = arith.constant 0 : index
    %108 = vector.load %arg9[%c12, %c0_54] : memref<100x256xf32, #tpu.memory_space<vmem>>, vector<4x256xf32>
    tpu.vector_store %arg9[%c12, %c0_54], %107 {strides = array<i32>} : memref<100x256xf32, #tpu.memory_space<vmem>>, vector<4x256xf32>,
    %c0_55 = arith.constant 0 : index
    %c19 = arith.constant 19 : index
    %109 = vector.load %arg8[%c0_55, %c19] : memref<4x324xf32, #tpu.memory_space<vmem>>, vector<4x256xf32>
    %110 = vector.broadcast %104 : vector<1x256xf32> to vector<4x256xf32>
    %111 = arith.mulf %109, %110 : vector<4x256xf32>
    %c32_56 = arith.constant 32 : index
    %c0_57 = arith.constant 0 : index
    %112 = vector.load %arg9[%c32_56, %c0_57] : memref<100x256xf32, #tpu.memory_space<vmem>>, vector<4x256xf32>
    tpu.vector_store %arg9[%c32_56, %c0_57], %111 {strides = array<i32>} : memref<100x256xf32, #tpu.memory_space<vmem>>, vector<4x256xf32>,
    %c0_58 = arith.constant 0 : index
    %c35 = arith.constant 35 : index
    %113 = vector.load %arg8[%c0_58, %c35] : memref<4x324xf32, #tpu.memory_space<vmem>>, vector<4x256xf32>
    %114 = vector.broadcast %104 : vector<1x256xf32> to vector<4x256xf32>
    %115 = arith.mulf %113, %114 : vector<4x256xf32>
    %c52 = arith.constant 52 : index
    %c0_59 = arith.constant 0 : index
    %116 = vector.load %arg9[%c52, %c0_59] : memref<100x256xf32, #tpu.memory_space<vmem>>, vector<4x256xf32>
    tpu.vector_store %arg9[%c52, %c0_59], %115 {strides = array<i32>} : memref<100x256xf32, #tpu.memory_space<vmem>>, vector<4x256xf32>,
    %c0_60 = arith.constant 0 : index
    %c51 = arith.constant 51 : index
    %117 = vector.load %arg8[%c0_60, %c51] : memref<4x324xf32, #tpu.memory_space<vmem>>, vector<4x256xf32>
    %118 = vector.broadcast %104 : vector<1x256xf32> to vector<4x256xf32>
    %119 = arith.mulf %117, %118 : vector<4x256xf32>
    %c72 = arith.constant 72 : index
    %c0_61 = arith.constant 0 : index
    %120 = vector.load %arg9[%c72, %c0_61] : memref<100x256xf32, #tpu.memory_space<vmem>>, vector<4x256xf32>
    tpu.vector_store %arg9[%c72, %c0_61], %119 {strides = array<i32>} : memref<100x256xf32, #tpu.memory_space<vmem>>, vector<4x256xf32>,
    %c0_62 = arith.constant 0 : index
    %c67 = arith.constant 67 : index
    %121 = vector.load %arg8[%c0_62, %c67] : memref<4x324xf32, #tpu.memory_space<vmem>>, vector<4x256xf32>
    %122 = vector.broadcast %104 : vector<1x256xf32> to vector<4x256xf32>
    %123 = arith.mulf %121, %122 : vector<4x256xf32>
    %c92 = arith.constant 92 : index
    %c0_63 = arith.constant 0 : index
    %124 = vector.load %arg9[%c92, %c0_63] : memref<100x256xf32, #tpu.memory_space<vmem>>, vector<4x256xf32>
    tpu.vector_store %arg9[%c92, %c0_63], %123 {strides = array<i32>} : memref<100x256xf32, #tpu.memory_space<vmem>>, vector<4x256xf32>,
    %c2_i32 = arith.constant 2 : i32
    %125 = vector.broadcast %c2_i32 : i32 to vector<1x256xi32>
    %126 = arith.addi %21, %125 : vector<1x256xi32>
    %c0_i32_64 = arith.constant 0 : i32
    %127 = vector.broadcast %c0_i32_64 : i32 to vector<1x256xi32>
    %128 = arith.cmpi sge, %126, %127 : vector<1x256xi32>
    %c2_i32_65 = arith.constant 2 : i32
    %129 = vector.broadcast %c2_i32_65 : i32 to vector<1x256xi32>
    %130 = arith.addi %21, %129 : vector<1x256xi32>
    %c16_i32_66 = arith.constant 16 : i32
    %131 = vector.broadcast %c16_i32_66 : i32 to vector<1x256xi32>
    %132 = arith.cmpi slt, %130, %131 : vector<1x256xi32>
    %133 = arith.andi %128, %132 : vector<1x256xi1>
    %134 = arith.extui %133 : vector<1x256xi1> to vector<1x256xi32>
    %135 = arith.sitofp %134 : vector<1x256xi32> to vector<1x256xf32>
    %c0_67 = arith.constant 0 : index
    %c4_68 = arith.constant 4 : index
    %136 = vector.load %arg8[%c0_67, %c4_68] : memref<4x324xf32, #tpu.memory_space<vmem>>, vector<4x256xf32>
    %137 = vector.broadcast %135 : vector<1x256xf32> to vector<4x256xf32>
    %138 = arith.mulf %136, %137 : vector<4x256xf32>
    %c16_69 = arith.constant 16 : index
    %c0_70 = arith.constant 0 : index
    %139 = vector.load %arg9[%c16_69, %c0_70] : memref<100x256xf32, #tpu.memory_space<vmem>>, vector<4x256xf32>
    tpu.vector_store %arg9[%c16_69, %c0_70], %138 {strides = array<i32>} : memref<100x256xf32, #tpu.memory_space<vmem>>, vector<4x256xf32>,
    %c0_71 = arith.constant 0 : index
    %c20_72 = arith.constant 20 : index
    %140 = vector.load %arg8[%c0_71, %c20_72] : memref<4x324xf32, #tpu.memory_space<vmem>>, vector<4x256xf32>
    %141 = vector.broadcast %135 : vector<1x256xf32> to vector<4x256xf32>
    %142 = arith.mulf %140, %141 : vector<4x256xf32>
    %c36 = arith.constant 36 : index
    %c0_73 = arith.constant 0 : index
    %143 = vector.load %arg9[%c36, %c0_73] : memref<100x256xf32, #tpu.memory_space<vmem>>, vector<4x256xf32>
    tpu.vector_store %arg9[%c36, %c0_73], %142 {strides = array<i32>} : memref<100x256xf32, #tpu.memory_space<vmem>>, vector<4x256xf32>,
    %c0_74 = arith.constant 0 : index
    %c36_75 = arith.constant 36 : index
    %144 = vector.load %arg8[%c0_74, %c36_75] : memref<4x324xf32, #tpu.memory_space<vmem>>, vector<4x256xf32>
    %145 = vector.broadcast %135 : vector<1x256xf32> to vector<4x256xf32>
    %146 = arith.mulf %144, %145 : vector<4x256xf32>
    %c56 = arith.constant 56 : index
    %c0_76 = arith.constant 0 : index
    %147 = vector.load %arg9[%c56, %c0_76] : memref<100x256xf32, #tpu.memory_space<vmem>>, vector<4x256xf32>
    tpu.vector_store %arg9[%c56, %c0_76], %146 {strides = array<i32>} : memref<100x256xf32, #tpu.memory_space<vmem>>, vector<4x256xf32>,
    %c0_77 = arith.constant 0 : index
    %c52_78 = arith.constant 52 : index
    %148 = vector.load %arg8[%c0_77, %c52_78] : memref<4x324xf32, #tpu.memory_space<vmem>>, vector<4x256xf32>
    %149 = vector.broadcast %135 : vector<1x256xf32> to vector<4x256xf32>
    %150 = arith.mulf %148, %149 : vector<4x256xf32>
    %c76 = arith.constant 76 : index
    %c0_79 = arith.constant 0 : index
    %151 = vector.load %arg9[%c76, %c0_79] : memref<100x256xf32, #tpu.memory_space<vmem>>, vector<4x256xf32>
    tpu.vector_store %arg9[%c76, %c0_79], %150 {strides = array<i32>} : memref<100x256xf32, #tpu.memory_space<vmem>>, vector<4x256xf32>,
    %c0_80 = arith.constant 0 : index
    %c68_81 = arith.constant 68 : index
    %152 = vector.load %arg8[%c0_80, %c68_81] : memref<4x324xf32, #tpu.memory_space<vmem>>, vector<4x256xf32>
    %153 = vector.broadcast %135 : vector<1x256xf32> to vector<4x256xf32>
    %154 = arith.mulf %152, %153 : vector<4x256xf32>
    %c96 = arith.constant 96 : index
    %c0_82 = arith.constant 0 : index
    %155 = vector.load %arg9[%c96, %c0_82] : memref<100x256xf32, #tpu.memory_space<vmem>>, vector<4x256xf32>
    tpu.vector_store %arg9[%c96, %c0_82], %154 {strides = array<i32>} : memref<100x256xf32, #tpu.memory_space<vmem>>, vector<4x256xf32>,
    %c0_83 = arith.constant 0 : index
    %c0_84 = arith.constant 0 : index
    %156 = vector.load %arg2[%c0_83, %c0_84] : memref<8x100xf32, #tpu.memory_space<vmem>>, vector<8x100xf32>
    %c0_85 = arith.constant 0 : index
    %c0_86 = arith.constant 0 : index
    %157 = vector.load %arg9[%c0_85, %c0_86] : memref<100x256xf32, #tpu.memory_space<vmem>>, vector<100x256xf32>
    %cst_87 = arith.constant dense<0.000000e+00> : vector<8x256xf32>
    %158 = tpu.matmul %156, %157, %cst_87 {dimension_numbers = #tpu.dot_dimension_numbers<[1], [0], [0], [1], [0, 0, 1, 1], [], []>} : vector<8x100xf32>, vector<100x256xf32>, vector<8x256xf32> -> vector<8x256xf32>
    %c0_88 = arith.constant 0 : index
    %c0_89 = arith.constant 0 : index
    %159 = vector.load %arg3[%c0_88, %c0_89] : memref<8x1xf32, #tpu.memory_space<vmem>>, vector<8x1xf32>
    %160 = vector.broadcast %159 : vector<8x1xf32> to vector<8x256xf32>
    %161 = arith.addf %158, %160 : vector<8x256xf32>
    %cst_90 = arith.constant 0.000000e+00 : f32
    %162 = vector.broadcast %cst_90 : f32 to vector<8x256xf32>
    %163 = arith.cmpf ogt, %161, %162 : vector<8x256xf32>
    %cst_91 = arith.constant 2.000000e-01 : f32
    %164 = vector.broadcast %cst_91 : f32 to vector<8x256xf32>
    %165 = arith.mulf %164, %161 : vector<8x256xf32>
    %166 = arith.select %163, %161, %165 : vector<8x256xi1>, vector<8x256xf32>
    %c0_92 = arith.constant 0 : index
    %c0_93 = arith.constant 0 : index
    %167 = vector.load %arg4[%c0_92, %c0_93] : memref<4x8xf32, #tpu.memory_space<vmem>>, vector<4x8xf32>
    %cst_94 = arith.constant dense<0.000000e+00> : vector<4x256xf32>
    %168 = tpu.matmul %167, %166, %cst_94 {dimension_numbers = #tpu.dot_dimension_numbers<[1], [0], [0], [1], [0, 0, 1, 1], [], []>} : vector<4x8xf32>, vector<8x256xf32>, vector<4x256xf32> -> vector<4x256xf32>
    %c0_95 = arith.constant 0 : index
    %c0_96 = arith.constant 0 : index
    %169 = vector.load %arg5[%c0_95, %c0_96] : memref<4x4xf32, #tpu.memory_space<vmem>>, vector<4x4xf32>
    %cst_97 = arith.constant dense<0.000000e+00> : vector<4x256xf32>
    %170 = tpu.matmul %169, %1, %cst_97 {dimension_numbers = #tpu.dot_dimension_numbers<[1], [0], [0], [1], [0, 0, 1, 1], [], []>} : vector<4x4xf32>, vector<4x256xf32>, vector<4x256xf32> -> vector<4x256xf32>
    %171 = arith.addf %168, %170 : vector<4x256xf32>
    %c0_98 = arith.constant 0 : index
    %c0_99 = arith.constant 0 : index
    %172 = vector.load %arg6[%c0_98, %c0_99] : memref<4x1xf32, #tpu.memory_space<vmem>>, vector<4x1xf32>
    %173 = vector.broadcast %172 : vector<4x1xf32> to vector<4x256xf32>
    %174 = arith.addf %171, %173 : vector<4x256xf32>
    %cst_100 = arith.constant 0.000000e+00 : f32
    %175 = vector.broadcast %cst_100 : f32 to vector<4x256xf32>
    %176 = arith.cmpf ogt, %174, %175 : vector<4x256xf32>
    %cst_101 = arith.constant 2.000000e-01 : f32
    %177 = vector.broadcast %cst_101 : f32 to vector<4x256xf32>
    %178 = arith.mulf %177, %174 : vector<4x256xf32>
    %179 = arith.select %176, %174, %178 : vector<4x256xi1>, vector<4x256xf32>
    %180 = vector.shape_cast %179 : vector<4x256xf32> to vector<1x4x256xf32>
    %c0_102 = arith.constant 0 : index
    %c0_103 = arith.constant 0 : index
    %c0_104 = arith.constant 0 : index
    %181 = vector.load %arg7[%c0_102, %c0_103, %c0_104] : memref<1x4x256xf32, #tpu.memory_space<vmem>>, vector<1x4x256xf32>
    tpu.vector_store %arg7[%c0_102, %c0_103, %c0_104], %180 {strides = array<i32>} : memref<1x4x256xf32, #tpu.memory_space<vmem>>, vector<1x4x256xf32>,
    return
  }
  func.func @transform_0(%arg0: i32) -> (i32, i32, i32) {
    %c0_i32 = arith.constant 0 : i32
    %c0_i32_0 = arith.constant 0 : i32
    %c0_i32_1 = arith.constant 0 : i32
    return %arg0, %c0_i32, %c0_i32_0 : i32, i32, i32
  }
  func.func @transform_1(%arg0: i32) -> (i32, i32) {
    %c0_i32 = arith.constant 0 : i32
    %c0_i32_0 = arith.constant 0 : i32
    %c0_i32_1 = arith.constant 0 : i32
    return %c0_i32, %c0_i32_0 : i32, i32
  }
  func.func @transform_2(%arg0: i32) -> (i32, i32) {
    %c0_i32 = arith.constant 0 : i32
    %c0_i32_0 = arith.constant 0 : i32
    %c0_i32_1 = arith.constant 0 : i32
    return %c0_i32, %c0_i32_0 : i32, i32
  }
  func.func @transform_3(%arg0: i32) -> (i32, i32) {
    %c0_i32 = arith.constant 0 : i32
    %c0_i32_0 = arith.constant 0 : i32
    %c0_i32_1 = arith.constant 0 : i32
    return %c0_i32, %c0_i32_0 : i32, i32
  }
  func.func @transform_4(%arg0: i32) -> (i32, i32) {
    %c0_i32 = arith.constant 0 : i32
    %c0_i32_0 = arith.constant 0 : i32
    %c0_i32_1 = arith.constant 0 : i32
    return %c0_i32, %c0_i32_0 : i32, i32
  }
  func.func @transform_5(%arg0: i32) -> (i32, i32) {
    %c0_i32 = arith.constant 0 : i32
    %c0_i32_0 = arith.constant 0 : i32
    %c0_i32_1 = arith.constant 0 : i32
    return %c0_i32, %c0_i32_0 : i32, i32
  }
  func.func @transform_6(%arg0: i32) -> (i32, i32, i32) {
    %c0_i32 = arith.constant 0 : i32
    %c0_i32_0 = arith.constant 0 : i32
    %c0_i32_1 = arith.constant 0 : i32
    return %arg0, %c0_i32, %c0_i32_0 : i32, i32, i32
  }
}

</mosaic_0001>

<bundles_post_ra>
// kernel: tpu_custom_call.1
= control target key start
LH: loop header
LB: loop body
LE: loop exit
PB: predicated region body
PF: predicated region fallthrough
CT: control target
= control target key end

     0   :  { %11 = vsyncpa [#allocation5], 0  ;;  %s2237_s0 = inlined_call_operand.hbm [shape: f32[2,4,256], index: 0, kind: input, shape index: {}]   ;;  %s2238_s1 = inlined_call_operand.vmem [shape: f32[8,100], index: 1, kind: input, shape index: {}]   ;;  %s2239_s2 = inlined_call_operand.vmem [shape: f32[8,1], index: 2, kind: input, shape index: {}]   ;;  %s2240_s3 = inlined_call_operand.vmem [shape: f32[4,8], index: 3, kind: input, shape index: {}]   ;;  %s2241_s4 = inlined_call_operand.vmem [shape: f32[4,4], index: 4, kind: input, shape index: {}]   ;;  %s2242_s5 = inlined_call_operand.vmem [shape: f32[4,1], index: 5, kind: input, shape index: {}]   ;;  %s2243_s6 = inlined_call_operand.hbm [shape: f32[2,4,256], index: 6, kind: output, shape index: {}]  }
   0x1   :  { %13 = vsyncpa [#allocation5 + $0x1], 0 }
   0x2   :  { %14 = vsyncpa [#allocation6], 0 }
   0x3   :  { %16 = vsyncpa [#allocation6 + $0x1], 0  ;;  %s1710_s21 = smov 0   ;;  %s1712_s22 = smov 0  }
   0x4   :  { %s1714_s23 = smov 0   ;;  %s1716_s24 = smov 0  }
   0x5 LB: > { %s1731_s25 = sadd.s32 4294967295, %s1626_s24   ;;  %s1376_s26 = sadd.s32 4294967294, %s1626_s24   ;;  %s1626_s24 = sphi %s1716_s24, %s2265_s24   ;;  %s1622_s23 = sphi %s1714_s23, %s2264_s23   ;;  %s1618_s22 = sphi %s1712_s22, %s2263_s22   ;;  %s1614_s21 = sphi %s1710_s21, %s2262_s21  }
   0x6   : > { %s1735_s27 = sadd.s32 1, %s1626_s24   ;;  %s29_s28 = sadd.s32 1, %s1622_s23 }
   0x7   : > { %s26_s29 = ssub.s32 %s1626_s24, %s1735_s27  ;;  %p36_p0 = scmp.ne.s32.totalorder %s1622_s23, %s1618_s22 }
   0x8   : > { %p27_p1 = scmp.eq.s32.totalorder %s26_s29, 0  ;;  %p37_p2 = scmp.eq.s32.totalorder %s1626_s24, 0 }
   0x9   : > { %p42_p3 = scmp.ne.s32.totalorder %s1618_s22, %s1614_s21  ;;  %p43_p4 = scmp.eq.s32.totalorder %s1731_s25, 0 }
   0xa   : > { %s1747_s30 = scalar_select %p27_p1, %s1622_s23, %s29_s28  }
   0xb   : > { %p1749_p5 = por %p37_p2, %p36_p0  ;;  %p1753_p6 = por %p43_p4, %p42_p3 }
   0xc   : > { %p171_p7 = scmp.eq.s32.totalorder %s1731_s25, 1  ;;  %p177_p8 = scmp.eq.s32.totalorder %s1376_s26, 1 }
   0xd   : > { %p1445_p10 = scmp.lt.s32.totalorder %s1626_s24, 2  ;;  %s212_s11 = sand.u32 1, %s1622_s23  }
   0xe   : > { %p1760_p11 = por %p171_p7, %p36_p0  ;;  %p1764_p12 = por %p177_p8, %p42_p3 }
   0xf   : > { %s1405_s12 = sshll.u32 %s1626_s24, 7  ;;  %s1379_s13 = sshll.u32 %s212_s11, 3 }
  0x10   : > { %s2251_s9 = scalar_select %p1760_p11, 1, 0 }
  0x11   : > { %s2252_s10 = scalar_select %p1764_p12, 1, 0 }
  0x12   : > { %s1773_s16 = scalar_lea.hbm %s2237_s0, %s1405_s12  ;;  %s216_s17 = scalar_lea.vmem [#allocation4], %s1379_s13 }
  0x13   : > { %s224_s18 = sshll.u32 %s216_s17, 4  ;;  %p1777_p13 = pnand %p1445_p10, %p1749_p5  ;;  %s1781_s18 = int_to_ptr.vmem [resolvable:$true] %s224_s18 }
  0x14   : > { %s213_s20 = scalar_lea.sflag [#allocation5], %s212_s11  ;;  %s1530_s26 = scalar_lea.hbm %s1773_s16, 128 }
  0x15   : > { %p1531_p2 = scmp.ne.s32.totalorder %s1773_s16, %s1530_s26  ;;  %p1532_p3 = pneg %p1777_p13 }
  0x16   : > { %s1535_s7 = scalar_lea.hbm %s2237_s0, 256  ;;  %p1536_p5 = scmp.lt.u32.totalorder %s1773_s16, %s2237_s0 }
  0x17   : > { %p1533_p4 = pnand %p1532_p3, %p1531_p2  ;;  %p1537_p8 = scmp.lt.u32.totalorder %s1535_s7, %s1530_s26 }
  0x18   : > { %p1539_p9 = scmp.lt.u32.totalorder %s1530_s26, %s1773_s16 }
  0x19   : > { %p1534_p7 = pneg %p1533_p4  ;;  %p1538_p10 = por %p1537_p8, %p1536_p5 }
  0x1b   : > { %p1540_p0 = por %p1539_p9, %p1538_p10 }
  0x1d   : > { %p1541_p1 = pnand %p1540_p0, %p1534_p7 }
  0x1f   : > { %1544 = shalt.err (!%p1541_p1)
}
  0x20   : > { %s1545_s11 = scalar_lea.vmem %s1781_s18, 128  ;;  %s1628_s14 = smov [#allocation4]  }
  0x21   : > { %p1546_p2 = scmp.ne.s32.totalorder %s1781_s18, %s1545_s11  ;;  %s1550_s15 = sshll.u32 %s1628_s14, 4  ;;  %s1551_s15 = int_to_ptr.vmem [resolvable:$false] %s1550_s15 }
  0x22   : > { %s1552_s17 = scalar_lea.vmem %s1551_s15, 256  ;;  %p1553_p11 = scmp.lt.s32.totalorder %s1781_s18, %s1551_s15 }
  0x23   : > { %p1548_p4 = pnand %p1546_p2, %p1532_p3  ;;  %p1554_p5 = scmp.lt.s32.totalorder %s1552_s17, %s1545_s11 }
  0x25   : > { %p1549_p12 = pneg %p1548_p4  ;;  %p1555_p8 = por %p1554_p5, %p1553_p11 }
  0x27   : > { %p1556_p9 = pnand %p1555_p8, %p1549_p12 }
  0x29   : > { %1559 = shalt.err (!%p1556_p9)
}
  0x2a   : > { %1440 = dma.hbm_to_vmem [thread:$0]  (!%p1777_p13), %s1773_s16, 128, %s1781_s18, %s213_s20  }
  0x2b   : > { %p2254_p0 = scmp.lt.s32.totalorder %s1626_s24, 3  ;;  %p2255_p1 = scmp.ge.s32.totalorder %s1626_s24, 1 }
  0x2d   : > { %p230_p3 = pnand %p2255_p1, %p2254_p0 }
  0x2e   : > { %s1815_s26 = sand.u32 (!%p230_p3), 1, %s1618_s22  }
  0x2f   : > { %233 = sbr.rel (%p230_p3) target bundleno = 905 (0x389), region = 44  ;;  %s2245_s28 = sshll.u32 (!%p230_p3), %s1815_s26, 3 }
  0x30   : > { %s236_s29 = scalar_lea.sflag (!%p230_p3), [#allocation5], %s1815_s26  ;;  %s239_s19 = scalar_lea.vmem (!%p230_p3), [#allocation4], %s2245_s28 }
  0x36   : > { %1605 = dma.done.wait (%p1753_p6), %s236_s29, 128  }
  0x37   : > { %1607 = vsyncadd (%p1753_p6), %s236_s29, 4294967168  ;;  %v286_v0 = vlaneseq  ;;  %vm270_vm0 = vcmask 551936   ;;  %v1629_v1 = vmov 0.0   ;;  %v1829_v9 = vld [vmem:[%s239_s19] sm:$0xff]  ;;  %s1630_s8 = smov 34   ;;  %s1631_s16 = smov 3  }
  0x38   : > { %269 = vst [vmem:[#allocation2] sm:$0xff] %v1629_v1  ;;  %271 = vst.msk [vmem:[#allocation2 + $0x8] sm:$0xf] %vm270_vm0, %v1629_v1  ;;  %1103 = vmatprep.mubr.f32.mxu0 %v1629_v1  ;;  %1190 = vmatprep.mubr.f32.mxu1 %v1629_v1  ;;  %s1632_s18 = smov 1   ;;  %s1633_s20 = smov 17   ;;  %vm280_vm9 = vcmask 1043728  }
  0x39   : > { %v287_v2 = vand.u32 127, %v286_v0  ;;  %273 = vrot.lane.b32.xlu0 %v1829_v9, %s1630_s8  ;;  %s1634_s7 = smov 4   ;;  %s1635_s12 = smov 16   ;;  %vm281_vm10 = vcmask 1047556   ;;  %vm276_vm11 = vcmask 277504   ;;  %vm284_vm12 = vcmask 273408  }
  0x3a   : > { %s1636_s13 = smov 32   ;;  %s1637_s11 = smov 19   ;;  %vm282_vm13 = vmor %vm281_vm10, %vm280_vm9  ;;  %vm341_vm14 = vcmask 130048   ;;  %vm520_vm15 = vcmask 269312   ;;  %vm890_vm0 = vcmask 162816   ;;  %vm918_vm9 = vcmask 293888  }
  0x3b   : > { %v288_v3 = vadd.s32 128, %v287_v2  ;;  %v293_v4 = vand.u32 15, %v287_v2  ;;  %s1638_s14 = smov 33   ;;  %s1639_s15 = smov 20   ;;  %vm548_vm10 = vcmask 400384  }
  0x3c   : > { %s1640_s17 = smov 36   ;;  %s1641_s29 = smov 48  }
  0x3d   : > { %v300_v5 = vand.u32 15, %v288_v3  ;;  %v690_v6 = vadd.s32 1, %v293_v4  ;;  %v445_v7 = vadd.s32 4294967295, %v293_v4  ;;  %v843_v8 = vadd.s32 2, %v293_v4  ;;  %s1642_s19 = smov 35   ;;  %s1643_s8 = smov 49  }
  0x3e   : > { %v313_v10 = vadd.s32 4294967294, %v293_v4  ;;  %s1663_s28 = smov 127   ;;  %p2259_p11 = scmp.ne.s32.totalorder %s2251_s9, 0 }
  0x3f   : > { %v691_v11 = vadd.s32 1, %v300_v5  ;;  %vm694_vm1 = vcmp.lt.s32.totalorder %v690_v6, 16  ;;  %v446_v12 = vadd.s32 4294967295, %v300_v5  ;;  %vm447_vm2 = vcmp.ge.s32.totalorder %v445_v7, 0 }
  0x40   : > { %v1389_v13 = vsel %vm694_vm1, 1.0, %v1629_v1  ;;  %v1387_v14 = vsel %vm447_vm2, 1.0, %v1629_v1  ;;  %v844_v15 = vadd.s32 2, %v300_v5  ;;  %vm847_vm3 = vcmp.lt.s32.totalorder %v843_v8, 16 }
  0x41   : > { %vm695_vm4 = vcmp.lt.s32.totalorder %v691_v11, 16  ;;  %vm448_vm5 = vcmp.ge.s32.totalorder %v446_v12, 0  ;;  %v1391_v16 = vsel %vm847_vm3, 1.0, %v1629_v1  ;;  %v314_v17 = vadd.s32 4294967294, %v300_v5 }
  0x42   : > { %v1390_v18 = vsel %vm695_vm4, 1.0, %v1629_v1  ;;  %v1388_v19 = vsel %vm448_vm5, 1.0, %v1629_v1  ;;  %vm848_vm6 = vcmp.lt.s32.totalorder %v844_v15, 16  ;;  %vm315_vm7 = vcmp.ge.s32.totalorder %v313_v10, 0 }
  0x43   : > { %v706_v20 = vcombine.low %v1389_v13, %v1390_v18  ;;  %v461_v21 = vcombine.low %v1387_v14, %v1388_v19  ;;  %v1392_v22 = vsel %vm848_vm6, 1.0, %v1629_v1  ;;  %vm316_vm8 = vcmp.ge.s32.totalorder %v314_v17, 0 }
  0x44   : > { %v859_v23 = vcombine.low %v1391_v16, %v1392_v22  ;;  %v1385_v24 = vsel %vm315_vm7, 1.0, %v1629_v1  ;;  %v1386_v25 = vsel %vm316_vm8, 1.0, %v1629_v1  ;;  %vm369_vm1 = vcmask 261120  }
  0x45   : > { %707 = vrot.lane.b32.xlu1 %v706_v20, %s1631_s16  ;;  %462 = vrot.lane.b32.xlu0 %v461_v21, %s1632_s18  ;;  %v328_v26 = vcombine.low %v1385_v24, %v1386_v25  ;;  %s1644_s16 = smov 51   ;;  %s1645_s18 = smov 52   ;;  %vm738_vm2 = vcmask 154624   ;;  %vm465_vm3 = vcmask 7168   ;;  %vm396_vm4 = vcmask 392192  }
  0x46   : > { %vm710_vm5 = vcmask 23552   ;;  %vm765_vm6 = vcmask 285696   ;;  %vm493_vm7 = vcmask 138240   ;;  %vm863_vm8 = vcmask 31744  }
  0x49   : > { %490 = vrot.lane.b32.xlu1 %v461_v21, %s1633_s20  ;;  %860 = vrot.lane.b32.xlu0 %v859_v23, %s1634_s7  ;;  %s2246_s20 = smov 64   ;;  %s1647_s7 = smov 65  }
  0x4d   : > { %338 = vrot.lane.b32.xlu1 %v328_v26, %s1635_s12  ;;  %366 = vrot.lane.b32.xlu0 %v328_v26, %s1636_s13  ;;  %s1648_s12 = smov 67   ;;  %s1649_s13 = smov 68  }
  0x51   : > { %735 = vrot.lane.b32.xlu1 %v706_v20, %s1637_s11  ;;  %517 = vrot.lane.b32.xlu0 %v461_v21, %s1638_s14  ;;  %s1650_s11 = smov 94   ;;  %s1651_s14 = smov 126  }
  0x55   : > { %887 = vrot.lane.b32.xlu1 %v859_v23, %s1639_s15  ;;  %915 = vrot.lane.b32.xlu0 %v859_v23, %s1640_s17  ;;  %s1652_s15 = smov 111   ;;  %s1653_s17 = smov 110  }
  0x59   : > { %393 = vrot.lane.b32.xlu1 %v328_v26, %s1641_s29  ;;  %762 = vrot.lane.b32.xlu0 %v706_v20, %s1642_s19  ;;  %s2248_s29 = smov 78   ;;  %s1655_s19 = smov 124  }
  0x5d   : > { %545 = vrot.lane.b32.xlu1 %v461_v21, %s1643_s8  ;;  %790 = vrot.lane.b32.xlu0 %v706_v20, %s1644_s16  ;;  %s1656_s8 = smov 112   ;;  %s1657_s16 = smov 96  }
  0x61   : > { %942 = vrot.lane.b32.xlu1 %v859_v23, %s1645_s18  ;;  %421 = vrot.lane.b32.xlu0 %v328_v26, %s2246_s20  ;;  %s1658_s18 = smov 109   ;;  %s1664_s20 = smov 80  }
  0x65   : > { %572 = vrot.lane.b32.xlu1 %v461_v21, %s1647_s7  ;;  %817 = vrot.lane.b32.xlu0 %v706_v20, %s1648_s12  ;;  %s1659_s7 = smov 95   ;;  %s1660_s12 = smov 92  }
  0x69   : > { %970 = vrot.lane.b32.xlu1 %v859_v23, %s1649_s13  ;;  %s1661_s13 = smov 108  }
  0xab   : > { %v274_v27 = vpop.permute.xlu0 %273 }
  0xac   : > { %v275_v28 = vrot.slane %v274_v27, 4 }
  0xae   : > { %v277_v29 = vsel %vm276_vm11, %v275_v28, %v274_v27  ;;  %285 = vst.msk [vmem:[#allocation2 + $0x8] sm:$0xf] %vm284_vm12, %v275_v28  ;;  %vm793_vm11 = vcmask 416768   ;;  %vm945_vm12 = vcmask 424960  }
  0xaf   : > { %283 = vst.msk [vmem:[#allocation2] sm:$0xff] %vm282_vm13, %v277_v29  ;;  %vm424_vm13 = vcmask 523264  }
  0xb5   : > { %v636_v33 = vld [vmem:[#allocation2 + $0x8] sm:$0xf] }
  0xb6   : > { %v599_v34 = vld [vmem:[#allocation2 + $0x8] sm:$0xf]  ;;  %v1847_v35 = vld [vmem:[#allocation2] sm:$0xff]  ;;  %644 = vrot.lane.b32.xlu0 %v636_v33, %s1650_s11 }
  0xb7   : > { %v1841_v30 = vpop.permute.xlu1 %707  ;;  %v1843_v31 = vpop.permute.xlu0 %462  ;;  %607 = vrot.lane.b32.xlu1 %v599_v34, %s1651_s14  ;;  %v330_v39 = vmul.f32 %v328_v26, %v1847_v35  ;;  %v489_v40 = vld [vmem:[#allocation2 + $0x8] sm:$0xf]  ;;  %v1894_v60 = vcombine.low %v1847_v35, %v1847_v35  ;;  %v1963_v28 = vcombine.high %v1847_v35, %v1847_v35 }
  0xb8   : > { %v1528_v47 = vld [vmem:[#allocation2 + $0x8] ss:$0 sps:$4 sm:$0xff]   ;;  %v464_v15 = vrot.slane %v1843_v31, 4  ;;  %v709_v25 = vrot.slane %v1841_v30, 4 }
  0xb9   : > { %v332_v42 = vcombine.high %v330_v39, %v330_v39  ;;  %334 = vst [vmem:[#allocation3] sm:$0xf] %v330_v39  ;;  %v856_v50 = vld [vmem:[#allocation2 + $0x8] sm:$0xf] }
  0xba   : > { %640 = vrot.lane.b32.xlu0 %v1847_v35, %s1650_s11  ;;  %v365_v56 = vld [vmem:[#allocation2 + $0x8] sm:$0xf]  ;;  %v466_v20 = vsel %vm465_vm3, %v464_v15, %v1843_v31  ;;  %v711_v29 = vsel %vm710_vm5, %v709_v25, %v1841_v30  ;;  %vm665_vm3 = vcmask 637952   ;;  %vm646_vm5 = vcmask 769024  }
  0xbb   : > { %v1845_v32 = vpop.permute.xlu1 %490  ;;  %v1850_v36 = vpop.permute.xlu0 %860  ;;  %603 = vrot.lane.b32.xlu1 %v1847_v35, %s1651_s14  ;;  %335 = vst [vmem:[#allocation3 + $0x8] sm:$0xf] %v332_v42  ;;  %v734_v0 = vld [vmem:[#allocation2 + $0x8] sm:$0xf]  ;;  %v1950_v24 = vmul.f32 %v466_v20, %v1847_v35  ;;  %v1972_v34 = vmul.f32 %v711_v29, %v1847_v35 }
  0xbc   : > { %v492_v38 = vrot.slane %v1845_v32, 4  ;;  %v862_v46 = vrot.slane %v1850_v36, 4  ;;  %v914_v7 = vld [vmem:[#allocation2 + $0x8] sm:$0xf] }
  0xbd   : > { %v544_v13 = vld [vmem:[#allocation2 + $0x8] sm:$0xf] }
  0xbe   : > { %v498_v43 = vmul.f32 %v492_v38, %v489_v40  ;;  %v868_v52 = vmul.f32 %v862_v46, %v856_v50  ;;  %v1529_v19 = vld [vmem:[#allocation2 + $0x8] ss:$0 sps:$4 sm:$0xff]   ;;  %v494_v40 = vsel %vm493_vm7, %v492_v38, %v1845_v32  ;;  %v864_v32 = vsel %vm863_vm8, %v862_v46, %v1850_v36 }
  0xbf   : > { %v1853_v37 = vpop.permute.xlu1 %338  ;;  %v367_v44 = vpop.permute.xlu0 %366  ;;  %624 = vrot.lane.b32.xlu1 %v1847_v35, %s1653_s17  ;;  %v458_v31 = vld [vmem:[#allocation2 + $0x8] sm:$0xf]  ;;  %v497_v42 = vmul.f32 %v494_v40, %v1847_v35  ;;  %vm726_vm7 = vcmask 1022976  }
  0xc0   : > { %v340_v45 = vrot.slane %v1853_v37, 4  ;;  %506 = vrot.lane.b32.xlu0 %v498_v43, %s1652_s15  ;;  %v368_v53 = vrot.slane %v367_v44, 4  ;;  %v470_v39 = vmul.f32 %v464_v15, %v458_v31  ;;  %v337_v50 = vld [vmem:[#allocation2 + $0x8] sm:$0xf]  ;;  %v718_v15 = vcombine.low %v1972_v34, %v1972_v34 }
  0xc2   : > { %v342_v49 = vsel %vm341_vm14, %v340_v45, %v1853_v37  ;;  %v374_v58 = vmul.f32 %v368_v53, %v365_v56  ;;  %v370_v12 = vsel %vm369_vm1, %v368_v53, %v367_v44  ;;  %v474_v38 = vcombine.low %v470_v39, %v470_v39  ;;  %v516_v53 = vld [vmem:[#allocation2 + $0x8] sm:$0xf] }
  0xc3   : > { %v1861_v41 = vpop.permute.xlu1 %735  ;;  %v1876_v51 = vpop.permute.xlu0 %517  ;;  %661 = vrot.lane.b32.xlu1 %v1847_v35, %s2248_s29  ;;  %v1883_v54 = vmul.f32 %v342_v49, %v1847_v35  ;;  %v1930_v16 = vmul.f32 %v370_v12, %v1847_v35  ;;  %v867_v44 = vmul.f32 %v864_v32, %v1847_v35  ;;  %v346_v36 = vmul.f32 %v340_v45, %v337_v50 }
  0xc4   : > { %626 = vrot.lane.b32.xlu0 %v1528_v47, %s1653_s17  ;;  %v519_v55 = vrot.slane %v1876_v51, 4  ;;  %v737_v59 = vrot.slane %v1861_v41, 4  ;;  %vm575_vm14 = vcmask 531456   ;;  %vm973_vm1 = vcmask 556032  }
  0xc6   : > { %v521_v62 = vsel %vm520_vm15, %v519_v55, %v1876_v51  ;;  %v743_v2 = vmul.f32 %v737_v59, %v734_v0  ;;  %v739_v17 = vsel %vm738_vm2, %v737_v59, %v1861_v41  ;;  %v703_v41 = vld [vmem:[#allocation2 + $0x8] sm:$0xf]  ;;  %v525_v56 = vmul.f32 %v519_v55, %v516_v53 }
  0xc7   : > { %v1870_v48 = vpop.permute.xlu1 %887  ;;  %353 = vrot.lane.b32.xlu1 %v1883_v54, %s1656_s8  ;;  %v1896_v61 = vpop.permute.xlu0 %915  ;;  %v1907_v4 = vmul.f32 %v521_v62, %v1847_v35  ;;  %v1939_v21 = vmul.f32 %v739_v17, %v1847_v35  ;;  %v715_v43 = vmul.f32 %v709_v25, %v703_v41  ;;  %v871_v59 = vcombine.high %v867_v44, %v867_v44  ;;  %v392_v0 = vld [vmem:[#allocation2 + $0x8] sm:$0xf] }
  0xc8   : > { %876 = vrot.lane.b32.xlu0 %v868_v52, %s1655_s19  ;;  %v889_v63 = vrot.slane %v1870_v48, 4  ;;  %v917_v3 = vrot.slane %v1896_v61, 4  ;;  %v501_v52 = vcombine.high %v497_v42, %v497_v42  ;;  %v529_v45 = vcombine.low %v525_v56, %v525_v56  ;;  %v789_v25 = vld [vmem:[#allocation2 + $0x8] sm:$0xf] }
  0xc9   : > { %v719_v49 = vcombine.low %v715_v43, %v715_v43  ;;  %v349_v62 = vcombine.low %v1883_v54, %v1883_v54  ;;  %v746_v54 = vcombine.high %v1939_v21, %v1939_v21  ;;  %vm820_vm15 = vcmask 547840  }
  0xca   : > { %v891_v6 = vsel %vm890_vm0, %v889_v63, %v1870_v48  ;;  %v923_v8 = vmul.f32 %v917_v3, %v914_v7  ;;  %v919_v47 = vsel %vm918_vm9, %v917_v3, %v1896_v61  ;;  %v886_v61 = vld [vmem:[#allocation2 + $0x8] sm:$0xf]  ;;  %vm628_vm0 = vcmask 900096  }
  0xcb   : > { %v1887_v57 = vpop.permute.xlu1 %393  ;;  %622 = vrot.lane.b32.xlu1 %v1894_v60, %s1653_s17  ;;  %v1921_v11 = vmul.f32 %v891_v6, %v1847_v35  ;;  %s1662_s17 = smov 79   ;;  %v1945_v23 = vpop.permute.xlu0 %762  ;;  %v922_v46 = vmul.f32 %v919_v47, %v1847_v35  ;;  %v895_v37 = vmul.f32 %v889_v63, %v886_v61  ;;  %v761_v48 = vld [vmem:[#allocation2 + $0x8] sm:$0xf]  ;;  %vm1032_vm2 = vcmask 1043456  }
  0xcc   : > { %382 = vrot.lane.b32.xlu0 %v374_v58, %s1657_s16  ;;  %v395_v18 = vrot.slane %v1887_v57, 4  ;;  %v764_v27 = vrot.slane %v1945_v23, 4  ;;  %v350_v58 = vcombine.low %v346_v36, %v346_v36  ;;  %v571_v47 = vld [vmem:[#allocation2 + $0x8] sm:$0xf]  ;;  %vm508_vm9 = vcmask 908288  }
  0xcd   : > { %v899_v55 = vcombine.low %v895_v37, %v895_v37  ;;  %v926_v6 = vcombine.high %v922_v46, %v922_v46  ;;  %v816_v61 = vld [vmem:[#allocation2 + $0x8] sm:$0xf] }
  0xce   : > { %v397_v22 = vsel %vm396_vm4, %v395_v18, %v1887_v57  ;;  %v766_v33 = vsel %vm765_vm6, %v764_v27, %v1945_v23  ;;  %v401_v51 = vmul.f32 %v395_v18, %v392_v0  ;;  %v770_v63 = vmul.f32 %v764_v27, %v761_v48 }
  0xcf   : > { %v1909_v5 = vpop.permute.xlu1 %545  ;;  %532 = vrot.lane.b32.xlu1 %v1907_v4, %s1659_s7  ;;  %v1954_v26 = vmul.f32 %v397_v22, %v1847_v35  ;;  %v1978_v30 = vmul.f32 %v766_v33, %v1847_v35  ;;  %v791_v7 = vpop.permute.xlu0 %790  ;;  %v898_v22 = vcombine.low %v1921_v11, %v1921_v11  ;;  %vm609_vm4 = vcmask 1031168  }
  0xd0   : > { %751 = vrot.lane.b32.xlu0 %v743_v2, %s1658_s18  ;;  %v547_v10 = vrot.slane %v1909_v5, 4  ;;  %v377_v2 = vcombine.high %v1930_v16, %v1930_v16  ;;  %v405_v3 = vcombine.low %v401_v51, %v401_v51  ;;  %v774_v57 = vcombine.low %v770_v63, %v770_v63  ;;  %v673_v51 = vld [vmem:[#allocation2 + $0x8] sm:$0xf] }
  0xd1   : > { %v404_v12 = vcombine.low %v1954_v26, %v1954_v26  ;;  %v773_v17 = vcombine.low %v1978_v30, %v1978_v30  ;;  %vm481_vm6 = vcmask 1039360  }
  0xd2   : > { %v553_v14 = vmul.f32 %v547_v10, %v544_v13  ;;  %v549_v13 = vsel %vm548_vm10, %v547_v10, %v1909_v5  ;;  %v528_v5 = vcombine.low %v1907_v4, %v1907_v4  ;;  %vm357_vm10 = vcmask 916480  }
  0xd3   : > { %902 = vrot.lane.b32.xlu1 %v1921_v11, %s1661_s13  ;;  %v422_v27 = vpop.permute.xlu0 %421 }
  0xd4   : > { %931 = vrot.lane.b32.xlu0 %v923_v8, %s1660_s12  ;;  %v473_v8 = vcombine.low %v1950_v24, %v1950_v24  ;;  %v423_v33 = vrot.slane %v422_v27, 4 }
  0xd6   : > { %v425_v11 = vsel %vm424_vm13, %v423_v33, %v422_v27 }
  0xd7   : > { %378 = vrot.lane.b32.xlu1 %v1930_v16, %s1657_s16  ;;  %v552_v16 = vmul.f32 %v549_v13, %v1847_v35  ;;  %v428_v40 = vmul.f32 %v425_v11, %v1847_v35  ;;  %v818_v41 = vpop.permute.xlu0 %817 }
  0xd8   : > { %561 = vrot.lane.b32.xlu0 %v553_v14, %s1662_s17  ;;  %v792_v14 = vrot.slane %v791_v7, 4 }
  0xd9   : > { %v556_v20 = vcombine.high %v552_v16, %v552_v16  ;;  %v432_v32 = vcombine.high %v428_v40, %v428_v40 }
  0xda   : > { %v794_v18 = vsel %vm793_vm11, %v792_v14, %v791_v7  ;;  %v798_v4 = vmul.f32 %v792_v14, %v789_v25  ;;  %vm878_vm11 = vcmask 1014784  }
  0xdb   : > { %747 = vrot.lane.b32.xlu1 %v1939_v21, %s1658_s18  ;;  %v797_v10 = vmul.f32 %v794_v18, %v1847_v35 }
  0xdc   : > { %663 = vrot.lane.b32.xlu0 %v1529_v19, %s2248_s29  ;;  %s1665_s29 = smov 125   ;;  %v943_v19 = vpop.permute.xlu1 %942 }
  0xdd   : > { %v944_v21 = vrot.slane %v943_v19, 4  ;;  %v801_v23 = vcombine.high %v797_v10, %v797_v10 }
  0xdf   : > { %408 = vrot.lane.b32.xlu1 %v1954_v26, %s1664_s20  ;;  %v941_v26 = vld [vmem:[#allocation2 + $0x8] sm:$0xf] }
  0xe0   : > { %477 = vrot.lane.b32.xlu0 %v1950_v24, %s1663_s28  ;;  %v946_v24 = vsel %vm945_vm12, %v944_v21, %v943_v19  ;;  %v950_v29 = vmul.f32 %v944_v21, %v941_v26  ;;  %v573_v39 = vpop.permute.xlu1 %572  ;;  %vm536_vm12 = vcmask 777216  }
  0xe1   : > { %v949_v31 = vmul.f32 %v946_v24, %v1847_v35 }
  0xe3   : > { %642 = vrot.lane.b32.xlu1 %v1963_v28, %s1650_s11  ;;  %s2256_s11 = smov 78  }
  0xe4   : > { %605 = vrot.lane.b32.xlu0 %v1963_v28, %s1651_s14  ;;  %s1666_s14 = smov 93   ;;  %v971_v43 = vpop.permute.xlu1 %970 }
  0xe7   : > { %777 = vrot.lane.b32.xlu1 %v1978_v30, %s1666_s14  ;;  %v574_v30 = vrot.slane %v573_v39, 4 }
  0xe8   : > { %722 = vrot.lane.b32.xlu0 %v1972_v34, %s1665_s29  ;;  %v954_v34 = vcombine.low %v950_v29, %v950_v29 }
  0xe9   : > { %v580_v50 = vmul.f32 %v574_v30, %v571_v47 }
  0xeb   : > { %479 = vrot.lane.b32.xlu1 %v474_v38, %s1663_s28  ;;  %v576_v38 = vsel %vm575_vm14, %v574_v30, %v573_v39  ;;  %v584_v56 = vcombine.low %v580_v50, %v580_v50  ;;  %vm906_vm14 = vcmask 883712  }
  0xec   : > { %502 = vrot.lane.b32.xlu0 %v497_v42, %s1652_s15  ;;  %v953_v42 = vcombine.low %v949_v31, %v949_v31 }
  0xef   : > { %724 = vrot.lane.b32.xlu1 %v719_v49, %s1665_s29 }
  0xf0   : > { %872 = vrot.lane.b32.xlu0 %v867_v44, %s1655_s19  ;;  %v420_v44 = vld [vmem:[#allocation2 + $0x8] sm:$0xf] }
  0xf1   : > { %v429_v49 = vmul.f32 %v423_v33, %v420_v44 }
  0xf3   : > { %504 = vrot.lane.b32.xlu1 %v501_v52, %s1652_s15  ;;  %s2257_s15 = smov 64  }
  0xf4   : > { %927 = vrot.lane.b32.xlu0 %v922_v46, %s1660_s12  ;;  %v579_v46 = vmul.f32 %v576_v38, %v1847_v35 }
  0xf7   : > { %874 = vrot.lane.b32.xlu1 %v871_v59, %s1655_s19  ;;  %s1670_s19 = smov 62  }
  0xf8   : > { %355 = vrot.lane.b32.xlu0 %v350_v58, %s1656_s8 }
  0xfb   : > { %351 = vrot.lane.b32.xlu1 %v349_v62, %s1656_s8  ;;  %s1671_s8 = smov 61  }
  0xfc   : > { %534 = vrot.lane.b32.xlu0 %v529_v45, %s1659_s7 }
  0xff   : > { %380 = vrot.lane.b32.xlu1 %v377_v2, %s1657_s16  ;;  %s1672_s16 = smov 60  }
 0x100   : > { %904 = vrot.lane.b32.xlu0 %v899_v55, %s1661_s13  ;;  %v972_v55 = vrot.slane %v971_v43, 4 }
 0x103   : > { %749 = vrot.lane.b32.xlu1 %v746_v54, %s1658_s18 }
 0x104   : > { %410 = vrot.lane.b32.xlu0 %v405_v3, %s1664_s20 }
 0x107   : > { %929 = vrot.lane.b32.xlu1 %v926_v6, %s1660_s12 }
 0x108   : > { %779 = vrot.lane.b32.xlu0 %v774_v57, %s1666_s14  ;;  %v583_v57 = vcombine.low %v579_v46, %v579_v46 }
 0x10b   : > { %406 = vrot.lane.b32.xlu1 %v404_v12, %s1664_s20  ;;  %s1668_s20 = smov 76  }
 0x10c   : > { %475 = vrot.lane.b32.xlu0 %v473_v8, %s1663_s28  ;;  %s1667_s28 = smov 77  }
 0x10f   : > { %775 = vrot.lane.b32.xlu1 %v773_v17, %s1666_s14 }
 0x110   : > { %720 = vrot.lane.b32.xlu0 %v718_v15, %s1665_s29  ;;  %s1669_s29 = smov 63  }
 0x113   : > { %559 = vrot.lane.b32.xlu1 %v556_v20, %s1662_s17 }
 0x114   : > { %530 = vrot.lane.b32.xlu0 %v528_v5, %s1659_s7  ;;  %v1673_v5 = vmov 0  }
 0x115   : > { %1525 = vset.pattern.permute.xlu1 %v1673_v5  ;;  %1524 = vset.pattern.permute.xlu0 %v1673_v5 }
 0x117   : > { %804 = vrot.lane.b32.xlu1 %v801_v23, %s1667_s28 }
 0x118   : > { %900 = vrot.lane.b32.xlu0 %v898_v22, %s1661_s13  ;;  %s1292_s13 = scalar_lea.sflag [#allocation6], %s1815_s26 }
 0x11b   : > { %957 = vrot.lane.b32.xlu1 %v949_v31, %s1668_s20 }
 0x11c   : > { %806 = vrot.lane.b32.xlu0 %v798_v4, %s1667_s28 }
 0x11f   : > { %557 = vrot.lane.b32.xlu1 %v552_v16, %s1662_s17  ;;  %v969_v16 = vld [vmem:[#allocation2 + $0x8] sm:$0xf] }
 0x120   : > { %959 = vrot.lane.b32.xlu0 %v954_v34, %s1668_s20  ;;  %v978_v17 = vmul.f32 %v972_v55, %v969_v16 }
 0x123   : > { %802 = vrot.lane.b32.xlu1 %v797_v10, %s1667_s28  ;;  %v1022_v10 = vld [vmem:[%s2239_s2] sm:$0xff] }
 0x124   : > { %659 = vrot.lane.b32.xlu0 %v1894_v60, %s2256_s11  ;;  %v819_v60 = vrot.slane %v818_v41, 4 }
 0x126   : > { %v821_v59 = vsel %vm820_vm15, %v819_v60, %v818_v41  ;;  %v825_v37 = vmul.f32 %v819_v60, %v816_v61  ;;  %vm384_vm15 = vcmask 785408  }
 0x127   : > { %435 = vrot.lane.b32.xlu1 %v432_v32, %s2257_s15  ;;  %v824_v62 = vmul.f32 %v821_v59, %v1847_v35 }
 0x128   : > { %955 = vrot.lane.b32.xlu0 %v953_v42, %s1668_s20  ;;  %v2055_v36 = vpop.permute.xlu0 %644  ;;  %v829_v48 = vcombine.low %v825_v37, %v825_v37 }
 0x129   : > { %v2058_v52 = vpop.permute.xlu1 %607  ;;  %v828_v12 = vcombine.low %v824_v62, %v824_v62 }
 0x12b   : > { %587 = vrot.lane.b32.xlu1 %v579_v46, %s1669_s29 }
 0x12c   : > { %437 = vrot.lane.b32.xlu0 %v429_v49, %s2257_s15  ;;  %v2062_v53 = vpop.permute.xlu0 %640 }
 0x12d   : > { %v2064_v58 = vpop.permute.xlu1 %603 }
 0x12f   : > { %679 = vrot.lane.b32.xlu1 %v1963_v28, %s1670_s19  ;;  %v974_v28 = vsel %vm973_vm1, %v972_v55, %v971_v43  ;;  %vm753_vm1 = vcmask 891904  }
 0x130   : > { %589 = vrot.lane.b32.xlu0 %v584_v56, %s1669_s29  ;;  %v977_v6 = vmul.f32 %v974_v28, %v1847_v35 }
 0x131   : > { %v625_v0 = vpop.permute.xlu1 %624 }
 0x132   : > { %v2068_v45 = vpop.permute.xlu0 %506  ;;  %v981_v14 = vcombine.high %v977_v6, %v977_v6 }
 0x133   : > { %832 = vrot.lane.b32.xlu1 %v824_v62, %s1671_s8 }
 0x134   : > { %681 = vrot.lane.b32.xlu0 %v673_v51, %s1670_s19 }
 0x135   : > { %v2071_v63 = vpop.permute.xlu1 %661 }
 0x136   : > { %v627_v2 = vpop.permute.xlu0 %626 }
 0x137   : > { %v630_v3 = vsel %vm628_vm0, %v625_v0, %v627_v2  ;;  %433 = vrot.lane.b32.xlu1 %v428_v40, %s2257_s15 }
 0x138   : > { %634 = vst [vmem:[#allocation3 + $0x38] sm:$0xf0] %v630_v3  ;;  %834 = vrot.lane.b32.xlu0 %v829_v48, %s1671_s8 }
 0x139   : > { %v2078_v7 = vpop.permute.xlu1 %353 }
 0x13a   : > { %v2075_v54 = vpop.permute.xlu0 %876 }
 0x13b   : > { %677 = vrot.lane.b32.xlu1 %v1847_v35, %s1670_s19  ;;  %v1118_v35 = vcombine.high %v1829_v9, %v1829_v9  ;;  %s2258_s19 = sshll.u32 %s1815_s26, 3 }
 0x13c   : > { %585 = vrot.lane.b32.xlu0 %v583_v57, %s1669_s29  ;;  %s1406_s29 = sshll.u32 %s1731_s25, 7  ;;  %s1674_s25 = smov [#allocation7]  }
 0x13d   : > { %v623_v13 = vpop.permute.xlu1 %622  ;;  %1396 = vmatprep.subr.msk.mxu1 %vm1032_vm2, %v1118_v35  ;;  %s2193_s12 = scalar_lea.hbm %s2243_s6, %s1406_s29  ;;  %s1564_s14 = sshll.u32 %s1674_s25, 4  ;;  %s1565_s14 = int_to_ptr.vmem [resolvable:$false] %s1564_s14 }
 0x13e   : > { %v2082_v8 = vpop.permute.xlu0 %382  ;;  %v629_v15 = vsel %vm628_vm0, %v623_v13, %v625_v0  ;;  %1397 = vmatpush1.msk.msra.mxu1 %vm1032_vm2, %v1829_v9  ;;  %vm412_vm0 = vcmask 654336   ;;  %s1566_s28 = scalar_lea.vmem %s1565_s14, 256 }
 0x13f   : > { %633 = vst [vmem:[#allocation3 + $0x30] sm:$0xf0] %v629_v15  ;;  %984 = vrot.lane.b32.xlu1 %v981_v14, %s1672_s16 }
 0x140   : > { %830 = vrot.lane.b32.xlu0 %v828_v12, %s1671_s8  ;;  %s267_s8 = scalar_lea.vmem [#allocation7], %s2258_s19 }
 0x141   : > { %v2087_v19 = vpop.permute.xlu1 %532 }
 0x142   : > { %v2085_v18 = vpop.permute.xlu0 %751 }
 0x143   : > { %982 = vrot.lane.b32.xlu1 %v977_v6, %s1672_s16 }
 0x144   : > { %986 = vrot.lane.b32.xlu0 %v978_v17, %s1672_s16  ;;  %s1306_s16 = sshll.u32 %s267_s8, 4  ;;  %s2195_s16 = int_to_ptr.vmem [resolvable:$true] %s1306_s16 }
 0x145   : > { %v2097_v21 = vpop.permute.xlu1 %902  ;;  %s1560_s17 = scalar_lea.vmem %s2195_s16, 128  ;;  %p1567_p7 = scmp.lt.s32.totalorder %s2195_s16, %s1565_s14 }
 0x146   : > { %v2094_v20 = vpop.permute.xlu0 %931  ;;  %p1561_p6 = scmp.ne.s32.totalorder %s2195_s16, %s1560_s17  ;;  %p1568_p10 = scmp.lt.s32.totalorder %s1566_s28, %s1560_s17 }
 0x148   : > { %1025 = vperm.xlu0 %1524, %v1022_v10   ;;  %p1562_p12 = pnand %p1561_p6, %p2259_p11  ;;  %p1569_p2 = por %p1568_p10, %p1567_p7 }
 0x149   : > { %v2103_v23 = vpop.permute.xlu1 %378 }
 0x14a   : > { %v2101_v22 = vpop.permute.xlu0 %561  ;;  %p1563_p13 = pneg %p1562_p12 }
 0x14c   : > { %p1570_p4 = pnand %p1569_p2, %p1563_p13 }
 0x14d   : > { %v2105_v25 = vpop.permute.xlu1 %747 }
 0x14e   : > { %v664_v24 = vpop.permute.xlu0 %663 }
 0x14f   : > { %v667_v26 = vsel %vm665_vm3, %v2071_v63, %v664_v24 }
 0x150   : > { %671 = vst [vmem:[#allocation3 + $0x88] sm:$0xf0] %v667_v26 }
 0x151   : > { %v2111_v4 = vpop.permute.xlu1 %408 }
 0x152   : > { %v2109_v27 = vpop.permute.xlu0 %477 }
 0x155   : > { %v643_v29 = vpop.permute.xlu1 %642 }
 0x156   : > { %v606_v9 = vpop.permute.xlu0 %605  ;;  %v647_v34 = vsel %vm646_vm5, %v2062_v53, %v643_v29  ;;  %v648_v11 = vsel %vm646_vm5, %v643_v29, %v2055_v36  ;;  %vm933_vm5 = vcmask 752640  }
 0x157   : > { %v610_v31 = vsel %vm609_vm4, %v2064_v58, %v606_v9  ;;  %v611_v33 = vsel %vm609_vm4, %v606_v9, %v2058_v52  ;;  %651 = vst [vmem:[#allocation3 + $0x60] sm:$0xf] %v647_v34  ;;  %652 = vst [vmem:[#allocation3 + $0x68] sm:$0xf] %v648_v11  ;;  %vm781_vm4 = vcmask 760832  }
 0x158   : > { %614 = vst [vmem:[#allocation3 + $0x10] sm:$0xf] %v610_v31  ;;  %615 = vst [vmem:[#allocation3 + $0x18] sm:$0xf] %v611_v33 }
 0x159   : > { %v2119_v40 = vpop.permute.xlu1 %777 }
 0x15a   : > { %v2117_v39 = vpop.permute.xlu0 %722 }
 0x15d   : > { %v480_v41 = vpop.permute.xlu1 %479 }
 0x15e   : > { %v503_v30 = vpop.permute.xlu0 %502  ;;  %v483_v42 = vsel %vm481_vm6, %v2109_v27, %v480_v41 }
 0x15f   : > { %487 = vst [vmem:[#allocation3 + $0x8] sm:$0xf0] %v483_v42 }
 0x161   : > { %v725_v32 = vpop.permute.xlu1 %724 }
 0x162   : > { %v873_v43 = vpop.permute.xlu0 %872  ;;  %v728_v38 = vsel %vm726_vm7, %v2117_v39, %v725_v32 }
 0x163   : > { %732 = vst [vmem:[#allocation3 + $0x18] sm:$0xf0] %v728_v38 }
 0x165   : > { %v505_v47 = vpop.permute.xlu1 %504 }
 0x166   : > { %v928_v44 = vpop.permute.xlu0 %927  ;;  %v509_v49 = vsel %vm508_vm9, %v503_v30, %v505_v47  ;;  %v510_v50 = vsel %vm508_vm9, %v505_v47, %v2068_v45  ;;  %v997_v56 = vld [vmem:[#allocation3 + $0x8] sm:$0xff]  ;;  %vm563_vm9 = vcmask 646144  }
 0x167   : > { %513 = vst [vmem:[#allocation3 + $0x30] sm:$0xf] %v509_v49  ;;  %514 = vst [vmem:[#allocation3 + $0x38] sm:$0xf] %v510_v50 }
 0x169   : > { %v875_v46 = vpop.permute.xlu1 %874 }
 0x16a   : > { %v356_v36 = vpop.permute.xlu0 %355  ;;  %v879_v60 = vsel %vm878_vm11, %v873_v43, %v875_v46  ;;  %v880_v53 = vsel %vm878_vm11, %v875_v46, %v2075_v54  ;;  %v999_v58 = vld [vmem:[#allocation3 + $0x18] sm:$0xff]  ;;  %vm836_vm11 = vcmask 498688  }
 0x16b   : > { %v359_v52 = vsel %vm357_vm10, %v2078_v7, %v356_v36  ;;  %883 = vst [vmem:[#allocation3 + $0x20] sm:$0xf] %v879_v60  ;;  %884 = vst [vmem:[#allocation3 + $0x28] sm:$0xf] %v880_v53  ;;  %v1407_v59 = vpack.c.bf16 %v999_v58, %v997_v56 }
 0x16c   : > { %363 = vst [vmem:[#allocation3 + $0x28] sm:$0xf0] %v359_v52 }
 0x16d   : > { %v352_v37 = vpop.permute.xlu1 %351  ;;  %1408 = vmatprep.subr.bf16.mxu0 %v1407_v59 }
 0x16e   : > { %v535_v61 = vpop.permute.xlu0 %534  ;;  %v358_v62 = vsel %vm357_vm10, %v352_v37, %v2078_v7  ;;  %v1003_v11 = vld [vmem:[#allocation3 + $0x38] sm:$0xff]  ;;  %v1002_v42 = vld [vmem:[#allocation3 + $0x30] sm:$0xff]  ;;  %vm683_vm10 = vcmask 506880  }
 0x16f   : > { %v538_v45 = vsel %vm536_vm12, %v2087_v19, %v535_v61  ;;  %362 = vst [vmem:[#allocation3 + $0x20] sm:$0xf0] %v358_v62 }
 0x170   : > { %542 = vst [vmem:[#allocation3 + $0x58] sm:$0xf0] %v538_v45 }
 0x171   : > { %v381_v51 = vpop.permute.xlu1 %380 }
 0x172   : > { %v905_v0 = vpop.permute.xlu0 %904  ;;  %v385_v2 = vsel %vm384_vm15, %v2103_v23, %v381_v51  ;;  %v386_v48 = vsel %vm384_vm15, %v381_v51, %v2082_v8 }
 0x173   : > { %v908_v55 = vsel %vm906_vm14, %v2097_v21, %v905_v0  ;;  %389 = vst [vmem:[#allocation3 + $0x50] sm:$0xf] %v385_v2  ;;  %390 = vst [vmem:[#allocation3 + $0x58] sm:$0xf] %v386_v48 }
 0x174   : > { %912 = vst [vmem:[#allocation3 + $0x48] sm:$0xf0] %v908_v55 }
 0x175   : > { %v750_v28 = vpop.permute.xlu1 %749 }
 0x176   : > { %v411_v3 = vpop.permute.xlu0 %410  ;;  %v754_v57 = vsel %vm753_vm1, %v2105_v25, %v750_v28  ;;  %v755_v6 = vsel %vm753_vm1, %v750_v28, %v2085_v18 }
 0x177   : > { %v414_v54 = vsel %vm412_vm0, %v2111_v4, %v411_v3  ;;  %758 = vst [vmem:[#allocation3 + $0x40] sm:$0xf] %v754_v57  ;;  %759 = vst [vmem:[#allocation3 + $0x48] sm:$0xf] %v755_v6 }
 0x178   : > { %418 = vst [vmem:[#allocation3 + $0x78] sm:$0xf0] %v414_v54 }
 0x179   : > { %v930_v8 = vpop.permute.xlu1 %929 }
 0x17a   : > { %v780_v7 = vpop.permute.xlu0 %779  ;;  %v934_v13 = vsel %vm933_vm5, %v928_v44, %v930_v8  ;;  %v935_v14 = vsel %vm933_vm5, %v930_v8, %v2094_v20 }
 0x17b   : > { %v783_v12 = vsel %vm781_vm4, %v2119_v40, %v780_v7  ;;  %938 = vst [vmem:[#allocation3 + $0x70] sm:$0xf] %v934_v13  ;;  %939 = vst [vmem:[#allocation3 + $0x78] sm:$0xf] %v935_v14 }
 0x17c   : > { %787 = vst [vmem:[#allocation3 + $0x68] sm:$0xf0] %v783_v12 }
 0x17d   : > { %v407_v16 = vpop.permute.xlu1 %406 }
 0x17e   : > { %v476_v15 = vpop.permute.xlu0 %475  ;;  %v413_v18 = vsel %vm412_vm0, %v407_v16, %v2111_v4  ;;  %v1001_v4 = vld [vmem:[#allocation3 + $0x28] sm:$0xff] }
 0x17f   : > { %v482_v17 = vsel %vm481_vm6, %v476_v15, %v2109_v27  ;;  %417 = vst [vmem:[#allocation3 + $0x70] sm:$0xf0] %v413_v18  ;;  %vm808_vm6 = vcmask 629760   ;;  %v1005_v30 = vld [vmem:[#allocation3 + $0x48] sm:$0xff] }
 0x180   : > { %486 = vst [vmem:[#allocation3] sm:$0xf0] %v482_v17 }
 0x181   : > { %v776_v5 = vpop.permute.xlu1 %775 }
 0x182   : > { %v721_v35 = vpop.permute.xlu0 %720  ;;  %v782_v20 = vsel %vm781_vm4, %v776_v5, %v2119_v40  ;;  %v1000_v40 = vld [vmem:[#allocation3 + $0x20] sm:$0xff]  ;;  %v1011_v47 = vld [vmem:[#allocation3 + $0x78] sm:$0xff] }
 0x183   : > { %v727_v10 = vsel %vm726_vm7, %v721_v35, %v2117_v39  ;;  %786 = vst [vmem:[#allocation3 + $0x60] sm:$0xf0] %v782_v20  ;;  %v1411_v39 = vpack.c.bf16 %v1003_v11, %v1001_v4  ;;  %v1413_v43 = vpack.c.bf16 %v1002_v42, %v1000_v40  ;;  %vm961_vm7 = vcmask 621568   ;;  %v1009_v44 = vld [vmem:[#allocation3 + $0x68] sm:$0xff]  ;;  %v1117_v42 = vld [vmem:[%s2241_s4] sm:$0xf] }
 0x184   : > { %731 = vst [vmem:[#allocation3 + $0x10] sm:$0xf0] %v727_v10  ;;  %v1419_v53 = vpack.c.bf16 %v1011_v47, %v1009_v44  ;;  %1398 = vmatmul.mubr.msk.f32.vlgmr.msra.gmra.mrb[0].mxu1 %vm863_vm8, %v1117_v42  ;;  %vm1197_vm8 = vcmask 64512  }
 0x185   : > { %v560_v24 = vpop.permute.xlu1 %559  ;;  %1265 = vmatprep.mubr.f32.mxu1 %v1629_v1  ;;  %v1116_v1 = vld [vmem:[%s2240_s3] sm:$0xf] }
 0x186   : > { %v531_v23 = vpop.permute.xlu0 %530  ;;  %v565_v26 = vsel %vm563_vm9, %v560_v24, %v2101_v22  ;;  %v1010_v37 = vld [vmem:[#allocation3 + $0x70] sm:$0xff] }
 0x187   : > { %v537_v25 = vsel %vm536_vm12, %v531_v23, %v2087_v19  ;;  %569 = vst [vmem:[#allocation3 + $0x88] sm:$0xf] %v565_v26  ;;  %v996_v31 = vld [vmem:[#allocation3] sm:$0xff]  ;;  %vm988_vm12 = vcmask 490496  }
 0x188   : > { %541 = vst [vmem:[#allocation3 + $0x50] sm:$0xf0] %v537_v25 }
 0x189   : > { %v805_v9 = vpop.permute.xlu1 %804 }
 0x18a   : > { %v901_v27 = vpop.permute.xlu0 %900  ;;  %v1008_v56 = vld [vmem:[#allocation3 + $0x60] sm:$0xff] }
 0x18b   : > { %v907_v29 = vsel %vm906_vm14, %v901_v27, %v2097_v21  ;;  %v998_v33 = vld [vmem:[#allocation3 + $0x10] sm:$0xff]  ;;  %v1007_v21 = vld [vmem:[#allocation3 + $0x58] sm:$0xff]  ;;  %v1421_v62 = vpack.c.bf16 %v1010_v37, %v1008_v56 }
 0x18c   : > { %911 = vst [vmem:[#allocation3 + $0x40] sm:$0xf0] %v907_v29  ;;  %v1409_v34 = vpack.c.bf16 %v998_v33, %v996_v31  ;;  %v1415_v32 = vpack.c.bf16 %v1007_v21, %v1005_v30 }
 0x18d   : > { %v958_v22 = vpop.permute.xlu1 %957 }
 0x18e   : > { %1410 = vmatpush1.bf16.msra.mxu0 %v1409_v34  ;;  %v807_v19 = vpop.permute.xlu0 %806  ;;  %v1013_v2 = vld [vmem:[#allocation3 + $0x88] sm:$0xff] }
 0x18f   : > { %v810_v41 = vsel %vm808_vm6, %v805_v9, %v807_v19  ;;  %1412 = vmatprep.subr.bf16.mxu0 %v1411_v39  ;;  %v1006_v46 = vld [vmem:[#allocation3 + $0x50] sm:$0xff] }
 0x190   : > { %814 = vst [vmem:[#allocation3 + $0x98] sm:$0xf] %v810_v41 }
 0x191   : > { %v558_v49 = vpop.permute.xlu1 %557 }
 0x192   : > { %1414 = vmatpush1.bf16.msra.mxu0 %v1413_v43  ;;  %v960_v38 = vpop.permute.xlu0 %959  ;;  %v564_v52 = vsel %vm563_vm9, %v558_v49, %v560_v24  ;;  %v1272_v43 = vld [vmem:[%s2242_s5] sm:$0xf] }
 0x193   : > { %v963_v50 = vsel %vm961_vm7, %v958_v22, %v960_v38  ;;  %1416 = vmatprep.subr.bf16.mxu0 %v1415_v32  ;;  %v1004_v36 = vld [vmem:[#allocation3 + $0x40] sm:$0xff]  ;;  %568 = vst [vmem:[#allocation3 + $0x80] sm:$0xf] %v564_v52  ;;  %1275 = vperm.xlu1 %1525, %v1272_v43  }
 0x194   : > { %967 = vst [vmem:[#allocation3 + $0x98] sm:$0xf0] %v963_v50  ;;  %v1417_v60 = vpack.c.bf16 %v1006_v46, %v1004_v36 }
 0x195   : > { %v803_v59 = vpop.permute.xlu1 %802 }
 0x196   : > { %1418 = vmatpush1.bf16.msra.mxu0 %v1417_v60  ;;  %v660_v58 = vpop.permute.xlu0 %659  ;;  %v809_v45 = vsel %vm808_vm6, %v803_v59, %v805_v9 }
 0x197   : > { %v666_v61 = vsel %vm665_vm3, %v660_v58, %v2071_v63  ;;  %1420 = vmatprep.subr.bf16.mxu0 %v1419_v53  ;;  %813 = vst [vmem:[#allocation3 + $0x90] sm:$0xf] %v809_v45  ;;  %vm591_vm3 = vcmask 515072  }
 0x198   : > { %670 = vst [vmem:[#allocation3 + $0x80] sm:$0xf0] %v666_v61 }
 0x199   : > { %v436_v51 = vpop.permute.xlu1 %435 }
 0x19a   : > { %1422 = vmatpush1.bf16.msra.mxu0 %v1421_v62  ;;  %v956_v0 = vpop.permute.xlu0 %955 }
 0x19b   : > { %v962_v55 = vsel %vm961_vm7, %v956_v0, %v958_v22  ;;  %v1015_v48 = vld [vmem:[#allocation3 + $0x98] sm:$0xff] }
 0x19c   : > { %966 = vst [vmem:[#allocation3 + $0x90] sm:$0xf0] %v962_v55  ;;  %v1423_v3 = vpack.c.bf16 %v1015_v48, %v1013_v2  ;;  %v995_v22 = vld [vmem:[%s2238_s1] sm:$0xff] }
 0x19d   : > { %v588_v54 = vpop.permute.xlu1 %587 }
 0x19e   : > { %1424 = vmatprep.subr.bf16.mxu0 %v1423_v3  ;;  %v438_v28 = vpop.permute.xlu0 %437 }
 0x19f   : > { %v440_v63 = vsel %vm424_vm13, %v436_v51, %v438_v28  ;;  %v1012_v8 = vld [vmem:[#allocation3 + $0x80] sm:$0xff] }
 0x1a0   : > { %444 = vst [vmem:[#allocation3 + $0xa8] sm:$0xf] %v440_v63 }
 0x1a1   : > { %v680_v6 = vpop.permute.xlu1 %679 }
 0x1a2   : > { %v590_v57 = vpop.permute.xlu0 %589 }
 0x1a3   : > { %v593_v7 = vsel %vm591_vm3, %v588_v54, %v590_v57  ;;  %v1014_v12 = vld [vmem:[#allocation3 + $0x90] sm:$0xff] }
 0x1a4   : > { %597 = vst [vmem:[#allocation3 + $0xa8] sm:$0xf0] %v593_v7  ;;  %v1425_v13 = vpack.c.bf16 %v1014_v12, %v1012_v8 }
 0x1a5   : > { %v833_v15 = vpop.permute.xlu1 %832 }
 0x1a6   : > { %1426 = vmatpush1.bf16.msra.mxu0 %v1425_v13  ;;  %v682_v14 = vpop.permute.xlu0 %681 }
 0x1a7   : > { %v685_v16 = vsel %vm683_vm10, %v680_v6, %v682_v14 }
 0x1a8   : > { %689 = vst [vmem:[#allocation3 + $0xb8] sm:$0xf] %v685_v16 }
 0x1a9   : > { %v434_v18 = vpop.permute.xlu1 %433 }
 0x1aa   : > { %v835_v17 = vpop.permute.xlu0 %834  ;;  %v439_v5 = vsel %vm424_vm13, %v434_v18, %v436_v51  ;;  %vm1028_vm13 = vcmask 818176  }
 0x1ab   : > { %v838_v35 = vsel %vm836_vm11, %v833_v15, %v835_v17  ;;  %443 = vst [vmem:[#allocation3 + $0xa0] sm:$0xf] %v439_v5  ;;  %v1017_v4 = vld [vmem:[#allocation3 + $0xa8] sm:$0xff] }
 0x1ac   : > { %842 = vst [vmem:[#allocation3 + $0xb8] sm:$0xf0] %v838_v35 }
 0x1ad   : > { %v678_v20 = vpop.permute.xlu1 %677 }
 0x1ae   : > { %v586_v10 = vpop.permute.xlu0 %585  ;;  %v684_v24 = vsel %vm683_vm10, %v678_v20, %v680_v6 }
 0x1af   : > { %v592_v23 = vsel %vm591_vm3, %v586_v10, %v588_v54  ;;  %688 = vst [vmem:[#allocation3 + $0xb0] sm:$0xf] %v684_v24 }
 0x1b0   : > { %596 = vst [vmem:[#allocation3 + $0xa0] sm:$0xf0] %v592_v23 }
 0x1b1   : > { %v985_v26 = vpop.permute.xlu1 %984 }
 0x1b2   : > { %v831_v25 = vpop.permute.xlu0 %830 }
 0x1b3   : > { %v837_v27 = vsel %vm836_vm11, %v831_v25, %v833_v15  ;;  %v1019_v9 = vld [vmem:[#allocation3 + $0xb8] sm:$0xff] }
 0x1b4   : > { %841 = vst [vmem:[#allocation3 + $0xb0] sm:$0xf0] %v837_v27  ;;  %v1427_v29 = vpack.c.bf16 %v1019_v9, %v1017_v4 }
 0x1b5   : > { %v983_v33 = vpop.permute.xlu1 %982 }
 0x1b6   : > { %1428 = vmatprep.subr.bf16.mxu0 %v1427_v29  ;;  %v987_v31 = vpop.permute.xlu0 %986  ;;  %v989_v11 = vsel %vm988_vm12, %v983_v33, %v985_v26 }
 0x1b7   : > { %v990_v34 = vsel %vm988_vm12, %v985_v26, %v987_v31  ;;  %993 = vst [vmem:[#allocation3 + $0xc0] sm:$0xf] %v989_v11  ;;  %v1016_v39 = vld [vmem:[#allocation3 + $0xa0] sm:$0xff] }
 0x1b8   : > { %994 = vst [vmem:[#allocation3 + $0xc8] sm:$0xf] %v990_v34 }
 0x1bb   : > { %v1018_v40 = vld [vmem:[#allocation3 + $0xb0] sm:$0xff] }
 0x1bc   : > { %v1429_v19 = vpack.c.bf16 %v1018_v40, %v1016_v39 }
 0x1be   : > { %1430 = vmatpush1.bf16.msra.mxu0 %v1429_v19  ;;  %v1020_v41 = vld [vmem:[#allocation3 + $0xc0] sm:$0xf] }
 0x1bf   : > { %v1021_v30 = vld [vmem:[#allocation3 + $0xc8] sm:$0xf] }
 0x1c0   : > { %1393 = vmatprep.subr.msk.mxu0 %vm1032_vm2, %v1021_v30 }
 0x1c2   : > { %1394 = vmatpush1.msk.msra.mxu0 %vm1032_vm2, %v1020_v41 }
 0x1c3   : > { %1395 = vmatmul.mubr.msk.f32.vlgmr.msra.gmra.mrb[0].mxu0 %vm1028_vm13, %v995_v22 }
 0x1c7   : > { %v1026_v21 = vpop.permute.xlu0 %1025 }
 0x212   : > { %v1276_v52 = vpop.permute.xlu1 %1275 }
 0x296   : > { %v1105_v32 = vpop.f32.mrb[0].mxu0 }
 0x297   : > { %v1106_v38 = vadd.f32 %v1105_v32, %v1026_v21  ;;  %v1107_v44 = vpop.f32.mrb[1].mxu0 }
 0x298   : > { %v1108_v47 = vadd.f32 %v1107_v44, %v1026_v21 }
 0x299   : > { %v1112_v49 = vmul.f32 0.2, %v1106_v38  ;;  %vm1110_vm2 = vcmp.gt.f32.partialorder %v1106_v38, 0.0 }
 0x29a   : > { %v1113_v50 = vmul.f32 0.2, %v1108_v47  ;;  %vm1111_vm14 = vcmp.gt.f32.partialorder %v1108_v47, 0.0 }
 0x29b   : > { %v1114_v46 = vsel %vm1110_vm2, %v1106_v38, %v1112_v49 }
 0x29c   : > { %v1115_v36 = vsel %vm1111_vm14, %v1108_v47, %v1113_v50 }
 0x29d   : > { %1201 = vmatprep.subr.mxu1 %v1115_v36 }
 0x29e   : > { %1202 = vmatpush1.msra.mxu1 %v1114_v46 }
 0x29f   : > { %1399 = vmatmul.mubr.msk.f32.vlgmr.msra.gmra.mrb[0].mxu1 %vm1197_vm8, %v1116_v1 }
 0x372   : > { %v1267_v60 = vpop.f32.mrb[0].mxu1 }
 0x373   : > { %v1278_v53 = vadd.f32 %v1276_v52, %v1267_v60  ;;  %v1269_v56 = vpop.f32.mrb[1].mxu1 }
 0x374   : > { %v1279_v58 = vadd.f32 %v1276_v52, %v1269_v56 }
 0x375   : > { %vm1280_vm15 = vcmp.gt.f32.partialorder %v1278_v53, 0.0  ;;  %v1282_v59 = vmul.f32 0.2, %v1278_v53 }
 0x376   : > { %vm1281_vm0 = vcmp.gt.f32.partialorder %v1279_v58, 0.0  ;;  %v1283_v61 = vmul.f32 0.2, %v1279_v58 }
 0x377   : > { %v1284_v37 = vsel %vm1280_vm15, %v1278_v53, %v1282_v59 }
 0x378   : > { %v1285_v45 = vsel %vm1281_vm0, %v1279_v58, %v1283_v61 }
 0x379   : > { %v1288_v62 = vcombine.low %v1284_v37, %v1285_v45 }
 0x37b   : > { %1290 = vst [vmem:[%s267_s8] sm:$0xff] %v1288_v62 }
 0x37c   : > { %1573 = shalt.err (!%p1570_p4)
}
 0x37d   : > { %s1574_s26 = scalar_lea.hbm %s2193_s12, 128  ;;  %s1578_s15 = scalar_lea.hbm %s2243_s6, 256 }
 0x37e   : > { %p1575_p5 = scmp.ne.s32.totalorder %s2193_s12, %s1574_s26  ;;  %p1579_p0 = scmp.lt.u32.totalorder %s2193_s12, %s2243_s6 }
 0x37f   : > { %p1580_p1 = scmp.lt.u32.totalorder %s1578_s15, %s1574_s26  ;;  %p1582_p6 = scmp.lt.u32.totalorder %s1574_s26, %s2193_s12 }
 0x380   : > { %p1576_p8 = pnand %p1575_p5, %p2259_p11 }
 0x381   : > { %p1581_p3 = por %p1580_p1, %p1579_p0 }
 0x382   : > { %p1577_p9 = pneg %p1576_p8 }
 0x383   : > { %p1583_p12 = por %p1582_p6, %p1581_p3 }
 0x385   : > { %p1584_p13 = pnand %p1583_p12, %p1577_p9 }
 0x387   : > { %1587 = shalt.err (!%p1584_p13)
}
 0x388   : > { %1435 = dma.vmem_to_hbm [thread:$0]  (%p2259_p11), %s2195_s16, 128, %s2193_s12, %s1292_s13  }
 0x389 PF: > { %s1318_s8 = sand.u32 1, %s1614_s21   ;;  %p2260_p7 = scmp.ne.s32.totalorder %s2252_s10, 0 }
 0x38a   : > { %p2261_p10 = scmp.ge.s32.totalorder %s1626_s24, 2  ;;  %s1319_s18 = scalar_lea.sflag [#allocation6], %s1318_s8 }
 0x38c   : > { %p1442_p2 = pnand %p2261_p10, %p2260_p7 }
 0x38e   : > { %1609 = dma.done.wait (!%p1442_p2), %s1319_s18, 128  }
 0x38f   : > { %1611 = vsyncadd (!%p1442_p2), %s1319_s18, 4294967168  ;;  %p19_p4 = scmp.ge.s32.totalorder %s1735_s27, 4   ;;  %s2262_s21 = smov %s1618_s22 }
 0x390   : > { %s2263_s22 = smov %s1622_s23  ;;  %s2264_s23 = smov %s1747_s30 }
 0x391   : > { %s2265_s24 = smov %s1735_s27  ;;  %21 = sbr.rel (!%p19_p4) target bundleno = 5 (0x5), region = 89 }
 0x398   :  { %1324 = vsyncpa [#allocation5], 1 }
 0x399   :  { %1326 = vsyncpa [#allocation5 + $0x1], 1 }
 0x39a   :  { %1327 = vsyncpa [#allocation6], 1 }
 0x39b   :  { %1329 = vsyncpa [#allocation6 + $0x1], 1 }

</bundles_post_ra>
